<compile_context>
chip_gen: v7x
topology: tpu7x:2x2x1
jax: 0.10.0
libtpu: 0.0.40
codegen_flags: <defaults>
</compile_context>

<pallas_src>
import functools

import jax
import jax.numpy as jnp
import numpy as np
from jax.experimental import pallas as pl
from jax.experimental.pallas import tpu as pltpu

LANE = 128


def _round_up(x, m):
    return (x + m - 1) // m * m


def _fused_kernel(x_ref, wc_ref, wm_ref, wa_ref, bf_ref, o_ref, *,
                  chunk, n_chunks, inv_count):
    """3x3-conv-as-matmul (+bias via ones column) + ReLU + global avg/max pool
    over (n, H, W) + concat-pool Linear head, for one batch element."""
    cf_pad = wc_ref.shape[-1]
    wc = wc_ref[...]                                   # (K_pad, cf_pad) bf16, hoisted

    def body(c, carry):
        sum8, max8 = carry
        row0 = pl.multiple_of(c * chunk, chunk)
        xc = x_ref[0, pl.ds(row0, chunk), :]           # (chunk, K_pad) bf16
        # single MXU push per chunk: K=32 covers all 9 taps * cin + bias column
        y = jnp.dot(xc, wc, preferred_element_type=jnp.float32)
        y = jnp.maximum(y, 0.0)                        # bias already folded in
        # fold pooling per chunk: reduce the leading (chunk//8) vreg groups with
        # pure VPU adds/max into an (8, cf_pad) partial (no XLU in the loop).
        y = y.reshape(chunk // 8, 8, cf_pad)
        sum8 = sum8 + jnp.sum(y, axis=0)
        max8 = jnp.maximum(max8, jnp.max(y, axis=0))
        return sum8, max8

    zeros8 = jnp.zeros((8, cf_pad), jnp.float32)
    # ReLU outputs are >= 0, so 0 is an exact identity for the running max
    # (and padded channels stay exactly 0 through the whole pipeline).
    sum8, max8 = jax.lax.fori_loop(0, n_chunks, body, (zeros8, zeros8),
                                   unroll=True)

    # Epilogue: one 8->1 cross-sublane reduce, then the concat-pool Linear as a
    # split-weight matmul (no in-kernel concat), lane-dense 128-wide output.
    avg = (jnp.sum(sum8, axis=0, keepdims=True) * inv_count).astype(jnp.bfloat16)
    mx = jnp.max(max8, axis=0, keepdims=True).astype(jnp.bfloat16)
    out = jnp.dot(mx, wm_ref[...], preferred_element_type=jnp.float32)
    out = out + jnp.dot(avg, wa_ref[...], preferred_element_type=jnp.float32)
    o_ref[0] = out + bf_ref[...]


def hms_forward(x, params):
    """HMSModel1.forward with a synthetic conv3x3+ReLU encoder.

    x: [bs, n, Cin, H, W] float32
    params:
      conv_w [Cf, Cin, 3, 3], conv_b [Cf]             (synthetic encoder)
      fc_w   [num_classes, 2*Cf], fc_b [num_classes]  (head; cols 0:Cf act on the
                                                       max pool, Cf:2Cf on the avg pool)
    returns [bs, num_classes] float32
    """
    bs, n, cin, H, W = x.shape
    conv_w, conv_b = params["conv_w"], params["conv_b"]
    fc_w, fc_b = params["fc_w"], params["fc_b"]
    cf = conv_w.shape[0]
    num_classes = fc_w.shape[0]

    cf_pad = _round_up(cf, LANE)
    nc_pad = _round_up(num_classes, LANE)
    K = 9 * cin                               # 27 for cin=3
    K_pad = _round_up(K + 1, 16)              # +1 ones column folds the conv bias
    total_rows = n * H * W                    # pooling is global over (n, H, W)

    # Row-chunk of 64-128 keeps the live f32 conv tile at <=16 vregs.
    chunk = next((c for c in (128, 64, 32, 16, 8) if total_rows % c == 0),
                 total_rows)
    n_chunks = total_rows // chunk

    # ---- input im2col (XLA prologue) ----------------------------------------
    # Full 3x3 unroll in the wrapper: 9x the (tiny, cin=3) input bytes in
    # exchange for a single K-dim MXU push per row-chunk in the kernel.
    # TODO(synk): for a real backbone keep only the width unroll in HBM and
    # concatenate the row taps in VMEM instead of this XLA-side unroll.
    xh = jnp.transpose(x, (0, 1, 3, 4, 2))                        # [bs,n,H,W,Cin]
    xh = jnp.pad(xh, ((0, 0), (0, 0), (1, 1), (1, 1), (0, 0)))    # [bs,n,H+2,W+2,Cin]
    taps = [xh[:, :, kh:kh + H, kw:kw + W, :]
            for kh in range(3) for kw in range(3)]
    xcol = jnp.concatenate(taps, axis=-1).reshape(bs, total_rows, K)
    xcol = jnp.concatenate(
        [xcol, jnp.ones((bs, total_rows, 1), xcol.dtype)], axis=-1)   # bias col
    xcol = jnp.pad(xcol, ((0, 0), (0, 0), (0, K_pad - (K + 1)))
                   ).astype(jnp.bfloat16)

    # ---- weight packing (hoisted to load time in a real deployment) ---------
    # rows ordered (kh, kw, ci) to match the tap concat above; bias as row K.
    wc = jnp.transpose(conv_w, (2, 3, 1, 0)).reshape(K, cf)
    wc = jnp.concatenate([wc, conv_b[None, :]], axis=0)
    wc = jnp.pad(wc, ((0, K_pad - (K + 1)), (0, cf_pad - cf))).astype(jnp.bfloat16)

    # fc over concat([max_pool, avg_pool]) split into two lane-padded halves.
    wm = jnp.pad(fc_w[:, :cf].T,
                 ((0, cf_pad - cf), (0, nc_pad - num_classes))).astype(jnp.bfloat16)
    wa = jnp.pad(fc_w[:, cf:].T,
                 ((0, cf_pad - cf), (0, nc_pad - num_classes))).astype(jnp.bfloat16)
    bf = jnp.pad(fc_b, (0, nc_pad - num_classes)).reshape(1, nc_pad
                 ).astype(jnp.float32)

    kernel = functools.partial(_fused_kernel, chunk=chunk, n_chunks=n_chunks,
                               inv_count=1.0 / float(total_rows))

    out = pl.pallas_call(
        kernel,
        out_shape=jax.ShapeDtypeStruct((bs, 1, nc_pad), jnp.float32),
        grid=(bs,),
        in_specs=[
            pl.BlockSpec((1, total_rows, K_pad), lambda b: (b, 0, 0)),
            pl.BlockSpec((K_pad, cf_pad), lambda b: (0, 0)),
            pl.BlockSpec((cf_pad, nc_pad), lambda b: (0, 0)),
            pl.BlockSpec((cf_pad, nc_pad), lambda b: (0, 0)),
            pl.BlockSpec((1, nc_pad), lambda b: (0, 0)),
        ],
        out_specs=pl.BlockSpec((1, 1, nc_pad), lambda b: (b, 0, 0)),
        compiler_params=pltpu.CompilerParams(
            dimension_semantics=("parallel",)),   # bs shards across v7x's 2 TCs
    )(xcol, wc, wm, wa, bf)

    return out[:, 0, :num_classes]


def hms_forward_ref(x, params):
    """Pure-JAX reference (same bf16 operand cast for the conv as the kernel;
    f32 HIGHEST-precision head)."""
    bs, n, cin, H, W = x.shape
    cf = params["conv_w"].shape[0]
    xb = x.astype(jnp.bfloat16).astype(jnp.float32).reshape(bs * n, cin, H, W)
    wb = params["conv_w"].astype(jnp.bfloat16).astype(jnp.float32)
    y = jax.lax.conv_general_dilated(
        xb, wb, window_strides=(1, 1), padding="SAME",
        dimension_numbers=("NCHW", "OIHW", "NCHW"),
        precision=jax.lax.Precision.HIGHEST)
    y = jnp.maximum(y + params["conv_b"].reshape(1, cf, 1, 1), 0.0)
    # view(-1,n,nc,H,W).permute(0,2,1,3,4).view(bs,nc,n*H,W) then concat-pool
    # reduces over all (n, H, W) positions per (bs, channel):
    y = y.reshape(bs, n, cf, H, W)
    avg_pool = y.mean(axis=(1, 3, 4))
    max_pool = y.max(axis=(1, 3, 4))
    pooled = jnp.concatenate([max_pool, avg_pool], axis=1)   # AdaptiveConcatPool2d
    return jnp.dot(pooled, params["fc_w"].T,
                   precision=jax.lax.Precision.HIGHEST) + params["fc_b"]


if __name__ == "__main__":
    # x: [bs, n_instance, ch, w, h] as HMSModel1.forward expects (n_instance=5)
    bs, n, cin, H, W = 2, 5, 3, 16, 16
    cf = 32            # encoder output channels (nc)
    num_classes = 1

    key = jax.random.PRNGKey(0)
    k_x, k_cw, k_cb, k_fw, k_fb = jax.random.split(key, 5)

    x = jax.random.normal(k_x, (bs, n, cin, H, W), jnp.float32)
    params = {
        "conv_w": jax.random.normal(k_cw, (cf, cin, 3, 3), jnp.float32)
                  * (1.0 / np.sqrt(cin * 9)),
        "conv_b": jax.random.normal(k_cb, (cf,), jnp.float32) * 0.01,
        "fc_w": jax.random.normal(k_fw, (num_classes, 2 * cf), jnp.float32)
                * (1.0 / np.sqrt(2 * cf)),
        "fc_b": jax.random.normal(k_fb, (num_classes,), jnp.float32) * 0.01,
    }

    out = jax.jit(hms_forward)(x, params)
    out = jax.block_until_ready(out)

    ref = hms_forward_ref(x, params)
    # bf16 matmul operands (f32 accumulation) in the kernel, incl. the bf16 head
    # cast requested by the perf review -> loosened tolerance vs the f32 ref.
    np.testing.assert_allclose(np.asarray(out), np.asarray(ref),
                               rtol=2e-2, atol=2e-2)
    print("KERNEL_OK")
</pallas_src>

<mosaic_0001>
module attributes {stable_mosaic.version = 11 : i64} {
  func.func @_fused_kernel(%arg0: i32, %arg1: memref<1x1280x32xbf16, #tpu.memory_space<vmem>>, %arg2: memref<32x128xbf16, #tpu.memory_space<vmem>>, %arg3: memref<128x128xbf16, #tpu.memory_space<vmem>>, %arg4: memref<128x128xbf16, #tpu.memory_space<vmem>>, %arg5: memref<1x128xf32, #tpu.memory_space<vmem>>, %arg6: memref<1x1x128xf32, #tpu.memory_space<vmem>>) attributes {dimension_semantics = [#tpu.dimension_semantics<parallel>], iteration_bounds = array<i64: 2>, scalar_prefetch = 0 : i64, scratch_operands = 0 : i64, tpu.core_type = #tpu.core_type<tc>, window_params = [{transform_indices = @transform_0, window_bounds = array<i64: 1, 1280, 32>}, {pipeline_mode = #tpu.pipeline_mode<synchronous>, transform_indices = @transform_1, window_bounds = array<i64: 32, 128>}, {pipeline_mode = #tpu.pipeline_mode<synchronous>, transform_indices = @transform_2, window_bounds = array<i64: 128, 128>}, {pipeline_mode = #tpu.pipeline_mode<synchronous>, transform_indices = @transform_3, window_bounds = array<i64: 128, 128>}, {pipeline_mode = #tpu.pipeline_mode<synchronous>, transform_indices = @transform_4, window_bounds = array<i64: 1, 128>}, {transform_indices = @transform_5, window_bounds = array<i64: 1, 1, 128>}]} {
    %c0 = arith.constant 0 : index
    %c0_0 = arith.constant 0 : index
    %0 = vector.load %arg2[%c0, %c0_0] : memref<32x128xbf16, #tpu.memory_space<vmem>>, vector<32x128xbf16>
    %cst = arith.constant 0.000000e+00 : f32
    %1 = vector.broadcast %cst : f32 to vector<8x128xf32>
    %c0_i32 = arith.constant 0 : i32
    %c128_i32 = arith.constant 128 : i32
    %2 = arith.muli %c0_i32, %c128_i32 : i32
    %3 = tpu.assume_multiple %2, 128 : i32
    %c0_1 = arith.constant 0 : index
    %4 = arith.index_cast %3 : i32 to index
    %c0_2 = arith.constant 0 : index
    %5 = vector.load %arg1[%c0_1, %4, %c0_2] : memref<1x1280x32xbf16, #tpu.memory_space<vmem>>, vector<1x128x32xbf16>
    %6 = vector.shape_cast %5 : vector<1x128x32xbf16> to vector<128x32xbf16>
    %cst_3 = arith.constant dense<0.000000e+00> : vector<128x128xf32>
    %7 = tpu.matmul %6, %0, %cst_3 {dimension_numbers = #tpu.dot_dimension_numbers<[1], [0], [0], [1], [0, 0, 1, 1], [], []>} : vector<128x32xbf16>, vector<32x128xbf16>, vector<128x128xf32> -> vector<128x128xf32>
    %cst_4 = arith.constant 0.000000e+00 : f32
    %8 = vector.broadcast %cst_4 : f32 to vector<128x128xf32>
    %9 = arith.maximumf %7, %8 : vector<128x128xf32>
    %10 = vector.shape_cast %9 : vector<128x128xf32> to vector<16x8x128xf32>
    %cst_5 = arith.constant dense<0.000000e+00> : vector<8x128xf32>
    %11 = vector.multi_reduction <add>, %10, %cst_5 [0] : vector<16x8x128xf32> to vector<8x128xf32>
    %12 = arith.addf %1, %11 : vector<8x128xf32>
    %cst_6 = arith.constant dense<0xFF800000> : vector<8x128xf32>
    %13 = vector.multi_reduction <maximumf>, %10, %cst_6 [0] : vector<16x8x128xf32> to vector<8x128xf32>
    %14 = arith.maximumf %1, %13 : vector<8x128xf32>
    %c1_i32 = arith.constant 1 : i32
    %c128_i32_7 = arith.constant 128 : i32
    %15 = arith.muli %c1_i32, %c128_i32_7 : i32
    %16 = tpu.assume_multiple %15, 128 : i32
    %c0_8 = arith.constant 0 : index
    %17 = arith.index_cast %16 : i32 to index
    %c0_9 = arith.constant 0 : index
    %18 = vector.load %arg1[%c0_8, %17, %c0_9] : memref<1x1280x32xbf16, #tpu.memory_space<vmem>>, vector<1x128x32xbf16>
    %19 = vector.shape_cast %18 : vector<1x128x32xbf16> to vector<128x32xbf16>
    %cst_10 = arith.constant dense<0.000000e+00> : vector<128x128xf32>
    %20 = tpu.matmul %19, %0, %cst_10 {dimension_numbers = #tpu.dot_dimension_numbers<[1], [0], [0], [1], [0, 0, 1, 1], [], []>} : vector<128x32xbf16>, vector<32x128xbf16>, vector<128x128xf32> -> vector<128x128xf32>
    %cst_11 = arith.constant 0.000000e+00 : f32
    %21 = vector.broadcast %cst_11 : f32 to vector<128x128xf32>
    %22 = arith.maximumf %20, %21 : vector<128x128xf32>
    %23 = vector.shape_cast %22 : vector<128x128xf32> to vector<16x8x128xf32>
    %cst_12 = arith.constant dense<0.000000e+00> : vector<8x128xf32>
    %24 = vector.multi_reduction <add>, %23, %cst_12 [0] : vector<16x8x128xf32> to vector<8x128xf32>
    %25 = arith.addf %12, %24 : vector<8x128xf32>
    %cst_13 = arith.constant dense<0xFF800000> : vector<8x128xf32>
    %26 = vector.multi_reduction <maximumf>, %23, %cst_13 [0] : vector<16x8x128xf32> to vector<8x128xf32>
    %27 = arith.maximumf %14, %26 : vector<8x128xf32>
    %c2_i32 = arith.constant 2 : i32
    %c128_i32_14 = arith.constant 128 : i32
    %28 = arith.muli %c2_i32, %c128_i32_14 : i32
    %29 = tpu.assume_multiple %28, 128 : i32
    %c0_15 = arith.constant 0 : index
    %30 = arith.index_cast %29 : i32 to index
    %c0_16 = arith.constant 0 : index
    %31 = vector.load %arg1[%c0_15, %30, %c0_16] : memref<1x1280x32xbf16, #tpu.memory_space<vmem>>, vector<1x128x32xbf16>
    %32 = vector.shape_cast %31 : vector<1x128x32xbf16> to vector<128x32xbf16>
    %cst_17 = arith.constant dense<0.000000e+00> : vector<128x128xf32>
    %33 = tpu.matmul %32, %0, %cst_17 {dimension_numbers = #tpu.dot_dimension_numbers<[1], [0], [0], [1], [0, 0, 1, 1], [], []>} : vector<128x32xbf16>, vector<32x128xbf16>, vector<128x128xf32> -> vector<128x128xf32>
    %cst_18 = arith.constant 0.000000e+00 : f32
    %34 = vector.broadcast %cst_18 : f32 to vector<128x128xf32>
    %35 = arith.maximumf %33, %34 : vector<128x128xf32>
    %36 = vector.shape_cast %35 : vector<128x128xf32> to vector<16x8x128xf32>
    %cst_19 = arith.constant dense<0.000000e+00> : vector<8x128xf32>
    %37 = vector.multi_reduction <add>, %36, %cst_19 [0] : vector<16x8x128xf32> to vector<8x128xf32>
    %38 = arith.addf %25, %37 : vector<8x128xf32>
    %cst_20 = arith.constant dense<0xFF800000> : vector<8x128xf32>
    %39 = vector.multi_reduction <maximumf>, %36, %cst_20 [0] : vector<16x8x128xf32> to vector<8x128xf32>
    %40 = arith.maximumf %27, %39 : vector<8x128xf32>
    %c3_i32 = arith.constant 3 : i32
    %c128_i32_21 = arith.constant 128 : i32
    %41 = arith.muli %c3_i32, %c128_i32_21 : i32
    %42 = tpu.assume_multiple %41, 128 : i32
    %c0_22 = arith.constant 0 : index
    %43 = arith.index_cast %42 : i32 to index
    %c0_23 = arith.constant 0 : index
    %44 = vector.load %arg1[%c0_22, %43, %c0_23] : memref<1x1280x32xbf16, #tpu.memory_space<vmem>>, vector<1x128x32xbf16>
    %45 = vector.shape_cast %44 : vector<1x128x32xbf16> to vector<128x32xbf16>
    %cst_24 = arith.constant dense<0.000000e+00> : vector<128x128xf32>
    %46 = tpu.matmul %45, %0, %cst_24 {dimension_numbers = #tpu.dot_dimension_numbers<[1], [0], [0], [1], [0, 0, 1, 1], [], []>} : vector<128x32xbf16>, vector<32x128xbf16>, vector<128x128xf32> -> vector<128x128xf32>
    %cst_25 = arith.constant 0.000000e+00 : f32
    %47 = vector.broadcast %cst_25 : f32 to vector<128x128xf32>
    %48 = arith.maximumf %46, %47 : vector<128x128xf32>
    %49 = vector.shape_cast %48 : vector<128x128xf32> to vector<16x8x128xf32>
    %cst_26 = arith.constant dense<0.000000e+00> : vector<8x128xf32>
    %50 = vector.multi_reduction <add>, %49, %cst_26 [0] : vector<16x8x128xf32> to vector<8x128xf32>
    %51 = arith.addf %38, %50 : vector<8x128xf32>
    %cst_27 = arith.constant dense<0xFF800000> : vector<8x128xf32>
    %52 = vector.multi_reduction <maximumf>, %49, %cst_27 [0] : vector<16x8x128xf32> to vector<8x128xf32>
    %53 = arith.maximumf %40, %52 : vector<8x128xf32>
    %c4_i32 = arith.constant 4 : i32
    %c128_i32_28 = arith.constant 128 : i32
    %54 = arith.muli %c4_i32, %c128_i32_28 : i32
    %55 = tpu.assume_multiple %54, 128 : i32
    %c0_29 = arith.constant 0 : index
    %56 = arith.index_cast %55 : i32 to index
    %c0_30 = arith.constant 0 : index
    %57 = vector.load %arg1[%c0_29, %56, %c0_30] : memref<1x1280x32xbf16, #tpu.memory_space<vmem>>, vector<1x128x32xbf16>
    %58 = vector.shape_cast %57 : vector<1x128x32xbf16> to vector<128x32xbf16>
    %cst_31 = arith.constant dense<0.000000e+00> : vector<128x128xf32>
    %59 = tpu.matmul %58, %0, %cst_31 {dimension_numbers = #tpu.dot_dimension_numbers<[1], [0], [0], [1], [0, 0, 1, 1], [], []>} : vector<128x32xbf16>, vector<32x128xbf16>, vector<128x128xf32> -> vector<128x128xf32>
    %cst_32 = arith.constant 0.000000e+00 : f32
    %60 = vector.broadcast %cst_32 : f32 to vector<128x128xf32>
    %61 = arith.maximumf %59, %60 : vector<128x128xf32>
    %62 = vector.shape_cast %61 : vector<128x128xf32> to vector<16x8x128xf32>
    %cst_33 = arith.constant dense<0.000000e+00> : vector<8x128xf32>
    %63 = vector.multi_reduction <add>, %62, %cst_33 [0] : vector<16x8x128xf32> to vector<8x128xf32>
    %64 = arith.addf %51, %63 : vector<8x128xf32>
    %cst_34 = arith.constant dense<0xFF800000> : vector<8x128xf32>
    %65 = vector.multi_reduction <maximumf>, %62, %cst_34 [0] : vector<16x8x128xf32> to vector<8x128xf32>
    %66 = arith.maximumf %53, %65 : vector<8x128xf32>
    %c5_i32 = arith.constant 5 : i32
    %c128_i32_35 = arith.constant 128 : i32
    %67 = arith.muli %c5_i32, %c128_i32_35 : i32
    %68 = tpu.assume_multiple %67, 128 : i32
    %c0_36 = arith.constant 0 : index
    %69 = arith.index_cast %68 : i32 to index
    %c0_37 = arith.constant 0 : index
    %70 = vector.load %arg1[%c0_36, %69, %c0_37] : memref<1x1280x32xbf16, #tpu.memory_space<vmem>>, vector<1x128x32xbf16>
    %71 = vector.shape_cast %70 : vector<1x128x32xbf16> to vector<128x32xbf16>
    %cst_38 = arith.constant dense<0.000000e+00> : vector<128x128xf32>
    %72 = tpu.matmul %71, %0, %cst_38 {dimension_numbers = #tpu.dot_dimension_numbers<[1], [0], [0], [1], [0, 0, 1, 1], [], []>} : vector<128x32xbf16>, vector<32x128xbf16>, vector<128x128xf32> -> vector<128x128xf32>
    %cst_39 = arith.constant 0.000000e+00 : f32
    %73 = vector.broadcast %cst_39 : f32 to vector<128x128xf32>
    %74 = arith.maximumf %72, %73 : vector<128x128xf32>
    %75 = vector.shape_cast %74 : vector<128x128xf32> to vector<16x8x128xf32>
    %cst_40 = arith.constant dense<0.000000e+00> : vector<8x128xf32>
    %76 = vector.multi_reduction <add>, %75, %cst_40 [0] : vector<16x8x128xf32> to vector<8x128xf32>
    %77 = arith.addf %64, %76 : vector<8x128xf32>
    %cst_41 = arith.constant dense<0xFF800000> : vector<8x128xf32>
    %78 = vector.multi_reduction <maximumf>, %75, %cst_41 [0] : vector<16x8x128xf32> to vector<8x128xf32>
    %79 = arith.maximumf %66, %78 : vector<8x128xf32>
    %c6_i32 = arith.constant 6 : i32
    %c128_i32_42 = arith.constant 128 : i32
    %80 = arith.muli %c6_i32, %c128_i32_42 : i32
    %81 = tpu.assume_multiple %80, 128 : i32
    %c0_43 = arith.constant 0 : index
    %82 = arith.index_cast %81 : i32 to index
    %c0_44 = arith.constant 0 : index
    %83 = vector.load %arg1[%c0_43, %82, %c0_44] : memref<1x1280x32xbf16, #tpu.memory_space<vmem>>, vector<1x128x32xbf16>
    %84 = vector.shape_cast %83 : vector<1x128x32xbf16> to vector<128x32xbf16>
    %cst_45 = arith.constant dense<0.000000e+00> : vector<128x128xf32>
    %85 = tpu.matmul %84, %0, %cst_45 {dimension_numbers = #tpu.dot_dimension_numbers<[1], [0], [0], [1], [0, 0, 1, 1], [], []>} : vector<128x32xbf16>, vector<32x128xbf16>, vector<128x128xf32> -> vector<128x128xf32>
    %cst_46 = arith.constant 0.000000e+00 : f32
    %86 = vector.broadcast %cst_46 : f32 to vector<128x128xf32>
    %87 = arith.maximumf %85, %86 : vector<128x128xf32>
    %88 = vector.shape_cast %87 : vector<128x128xf32> to vector<16x8x128xf32>
    %cst_47 = arith.constant dense<0.000000e+00> : vector<8x128xf32>
    %89 = vector.multi_reduction <add>, %88, %cst_47 [0] : vector<16x8x128xf32> to vector<8x128xf32>
    %90 = arith.addf %77, %89 : vector<8x128xf32>
    %cst_48 = arith.constant dense<0xFF800000> : vector<8x128xf32>
    %91 = vector.multi_reduction <maximumf>, %88, %cst_48 [0] : vector<16x8x128xf32> to vector<8x128xf32>
    %92 = arith.maximumf %79, %91 : vector<8x128xf32>
    %c7_i32 = arith.constant 7 : i32
    %c128_i32_49 = arith.constant 128 : i32
    %93 = arith.muli %c7_i32, %c128_i32_49 : i32
    %94 = tpu.assume_multiple %93, 128 : i32
    %c0_50 = arith.constant 0 : index
    %95 = arith.index_cast %94 : i32 to index
    %c0_51 = arith.constant 0 : index
    %96 = vector.load %arg1[%c0_50, %95, %c0_51] : memref<1x1280x32xbf16, #tpu.memory_space<vmem>>, vector<1x128x32xbf16>
    %97 = vector.shape_cast %96 : vector<1x128x32xbf16> to vector<128x32xbf16>
    %cst_52 = arith.constant dense<0.000000e+00> : vector<128x128xf32>
    %98 = tpu.matmul %97, %0, %cst_52 {dimension_numbers = #tpu.dot_dimension_numbers<[1], [0], [0], [1], [0, 0, 1, 1], [], []>} : vector<128x32xbf16>, vector<32x128xbf16>, vector<128x128xf32> -> vector<128x128xf32>
    %cst_53 = arith.constant 0.000000e+00 : f32
    %99 = vector.broadcast %cst_53 : f32 to vector<128x128xf32>
    %100 = arith.maximumf %98, %99 : vector<128x128xf32>
    %101 = vector.shape_cast %100 : vector<128x128xf32> to vector<16x8x128xf32>
    %cst_54 = arith.constant dense<0.000000e+00> : vector<8x128xf32>
    %102 = vector.multi_reduction <add>, %101, %cst_54 [0] : vector<16x8x128xf32> to vector<8x128xf32>
    %103 = arith.addf %90, %102 : vector<8x128xf32>
    %cst_55 = arith.constant dense<0xFF800000> : vector<8x128xf32>
    %104 = vector.multi_reduction <maximumf>, %101, %cst_55 [0] : vector<16x8x128xf32> to vector<8x128xf32>
    %105 = arith.maximumf %92, %104 : vector<8x128xf32>
    %c8_i32 = arith.constant 8 : i32
    %c128_i32_56 = arith.constant 128 : i32
    %106 = arith.muli %c8_i32, %c128_i32_56 : i32
    %107 = tpu.assume_multiple %106, 128 : i32
    %c0_57 = arith.constant 0 : index
    %108 = arith.index_cast %107 : i32 to index
    %c0_58 = arith.constant 0 : index
    %109 = vector.load %arg1[%c0_57, %108, %c0_58] : memref<1x1280x32xbf16, #tpu.memory_space<vmem>>, vector<1x128x32xbf16>
    %110 = vector.shape_cast %109 : vector<1x128x32xbf16> to vector<128x32xbf16>
    %cst_59 = arith.constant dense<0.000000e+00> : vector<128x128xf32>
    %111 = tpu.matmul %110, %0, %cst_59 {dimension_numbers = #tpu.dot_dimension_numbers<[1], [0], [0], [1], [0, 0, 1, 1], [], []>} : vector<128x32xbf16>, vector<32x128xbf16>, vector<128x128xf32> -> vector<128x128xf32>
    %cst_60 = arith.constant 0.000000e+00 : f32
    %112 = vector.broadcast %cst_60 : f32 to vector<128x128xf32>
    %113 = arith.maximumf %111, %112 : vector<128x128xf32>
    %114 = vector.shape_cast %113 : vector<128x128xf32> to vector<16x8x128xf32>
    %cst_61 = arith.constant dense<0.000000e+00> : vector<8x128xf32>
    %115 = vector.multi_reduction <add>, %114, %cst_61 [0] : vector<16x8x128xf32> to vector<8x128xf32>
    %116 = arith.addf %103, %115 : vector<8x128xf32>
    %cst_62 = arith.constant dense<0xFF800000> : vector<8x128xf32>
    %117 = vector.multi_reduction <maximumf>, %114, %cst_62 [0] : vector<16x8x128xf32> to vector<8x128xf32>
    %118 = arith.maximumf %105, %117 : vector<8x128xf32>
    %c9_i32 = arith.constant 9 : i32
    %c128_i32_63 = arith.constant 128 : i32
    %119 = arith.muli %c9_i32, %c128_i32_63 : i32
    %120 = tpu.assume_multiple %119, 128 : i32
    %c0_64 = arith.constant 0 : index
    %121 = arith.index_cast %120 : i32 to index
    %c0_65 = arith.constant 0 : index
    %122 = vector.load %arg1[%c0_64, %121, %c0_65] : memref<1x1280x32xbf16, #tpu.memory_space<vmem>>, vector<1x128x32xbf16>
    %123 = vector.shape_cast %122 : vector<1x128x32xbf16> to vector<128x32xbf16>
    %cst_66 = arith.constant dense<0.000000e+00> : vector<128x128xf32>
    %124 = tpu.matmul %123, %0, %cst_66 {dimension_numbers = #tpu.dot_dimension_numbers<[1], [0], [0], [1], [0, 0, 1, 1], [], []>} : vector<128x32xbf16>, vector<32x128xbf16>, vector<128x128xf32> -> vector<128x128xf32>
    %cst_67 = arith.constant 0.000000e+00 : f32
    %125 = vector.broadcast %cst_67 : f32 to vector<128x128xf32>
    %126 = arith.maximumf %124, %125 : vector<128x128xf32>
    %127 = vector.shape_cast %126 : vector<128x128xf32> to vector<16x8x128xf32>
    %cst_68 = arith.constant dense<0.000000e+00> : vector<8x128xf32>
    %128 = vector.multi_reduction <add>, %127, %cst_68 [0] : vector<16x8x128xf32> to vector<8x128xf32>
    %129 = arith.addf %116, %128 : vector<8x128xf32>
    %cst_69 = arith.constant dense<0xFF800000> : vector<8x128xf32>
    %130 = vector.multi_reduction <maximumf>, %127, %cst_69 [0] : vector<16x8x128xf32> to vector<8x128xf32>
    %131 = arith.maximumf %118, %130 : vector<8x128xf32>
    %c10_i32 = arith.constant 10 : i32
    %cst_70 = arith.constant dense<0.000000e+00> : vector<128xf32>
    %132 = vector.multi_reduction <add>, %129, %cst_70 [0] : vector<8x128xf32> to vector<128xf32>
    %133 = vector.shape_cast %132 : vector<128xf32> to vector<1x128xf32>
    %cst_71 = arith.constant 7.812500e-04 : f32
    %134 = vector.broadcast %cst_71 : f32 to vector<1x128xf32>
    %135 = arith.mulf %133, %134 : vector<1x128xf32>
    %136 = arith.truncf %135 : vector<1x128xf32> to vector<1x128xbf16>
    %cst_72 = arith.constant dense<0xFF800000> : vector<128xf32>
    %137 = vector.multi_reduction <maximumf>, %131, %cst_72 [0] : vector<8x128xf32> to vector<128xf32>
    %138 = vector.shape_cast %137 : vector<128xf32> to vector<1x128xf32>
    %139 = arith.truncf %138 : vector<1x128xf32> to vector<1x128xbf16>
    %c0_73 = arith.constant 0 : index
    %c0_74 = arith.constant 0 : index
    %140 = vector.load %arg3[%c0_73, %c0_74] : memref<128x128xbf16, #tpu.memory_space<vmem>>, vector<128x128xbf16>
    %cst_75 = arith.constant dense<0.000000e+00> : vector<1x128xf32>
    %141 = tpu.matmul %139, %140, %cst_75 {dimension_numbers = #tpu.dot_dimension_numbers<[1], [0], [0], [1], [0, 0, 1, 1], [], []>} : vector<1x128xbf16>, vector<128x128xbf16>, vector<1x128xf32> -> vector<1x128xf32>
    %c0_76 = arith.constant 0 : index
    %c0_77 = arith.constant 0 : index
    %142 = vector.load %arg4[%c0_76, %c0_77] : memref<128x128xbf16, #tpu.memory_space<vmem>>, vector<128x128xbf16>
    %cst_78 = arith.constant dense<0.000000e+00> : vector<1x128xf32>
    %143 = tpu.matmul %136, %142, %cst_78 {dimension_numbers = #tpu.dot_dimension_numbers<[1], [0], [0], [1], [0, 0, 1, 1], [], []>} : vector<1x128xbf16>, vector<128x128xbf16>, vector<1x128xf32> -> vector<1x128xf32>
    %144 = arith.addf %141, %143 : vector<1x128xf32>
    %c0_79 = arith.constant 0 : index
    %c0_80 = arith.constant 0 : index
    %145 = vector.load %arg5[%c0_79, %c0_80] : memref<1x128xf32, #tpu.memory_space<vmem>>, vector<1x128xf32>
    %146 = arith.addf %144, %145 : vector<1x128xf32>
    %c0_81 = arith.constant 0 : index
    %c0_82 = arith.constant 0 : index
    %c0_83 = arith.constant 0 : index
    %147 = vector.load %arg6[%c0_81, %c0_82, %c0_83] : memref<1x1x128xf32, #tpu.memory_space<vmem>>, vector<1x1x128xf32>
    %148 = vector.shape_cast %147 : vector<1x1x128xf32> to vector<1x128xf32>
    %149 = vector.shape_cast %146 : vector<1x128xf32> to vector<1x1x128xf32>
    tpu.vector_store %arg6[%c0_81, %c0_82, %c0_83], %149 {strides = array<i32>} : memref<1x1x128xf32, #tpu.memory_space<vmem>>, vector<1x1x128xf32>,
    return
  }
  func.func @transform_0(%arg0: i32) -> (i32, i32, i32) {
    %c0_i32 = arith.constant 0 : i32
    %c0_i32_0 = arith.constant 0 : i32
    %c0_i32_1 = arith.constant 0 : i32
    return %arg0, %c0_i32, %c0_i32_0 : i32, i32, i32
  }
  func.func @transform_1(%arg0: i32) -> (i32, i32) {
    %c0_i32 = arith.constant 0 : i32
    %c0_i32_0 = arith.constant 0 : i32
    %c0_i32_1 = arith.constant 0 : i32
    return %c0_i32, %c0_i32_0 : i32, i32
  }
  func.func @transform_2(%arg0: i32) -> (i32, i32) {
    %c0_i32 = arith.constant 0 : i32
    %c0_i32_0 = arith.constant 0 : i32
    %c0_i32_1 = arith.constant 0 : i32
    return %c0_i32, %c0_i32_0 : i32, i32
  }
  func.func @transform_3(%arg0: i32) -> (i32, i32) {
    %c0_i32 = arith.constant 0 : i32
    %c0_i32_0 = arith.constant 0 : i32
    %c0_i32_1 = arith.constant 0 : i32
    return %c0_i32, %c0_i32_0 : i32, i32
  }
  func.func @transform_4(%arg0: i32) -> (i32, i32) {
    %c0_i32 = arith.constant 0 : i32
    %c0_i32_0 = arith.constant 0 : i32
    %c0_i32_1 = arith.constant 0 : i32
    return %c0_i32, %c0_i32_0 : i32, i32
  }
  func.func @transform_5(%arg0: i32) -> (i32, i32, i32) {
    %c0_i32 = arith.constant 0 : i32
    %c0_i32_0 = arith.constant 0 : i32
    %c0_i32_1 = arith.constant 0 : i32
    return %arg0, %c0_i32, %c0_i32_0 : i32, i32, i32
  }
}

</mosaic_0001>

<bundles_post_ra>
// kernel: hms_forward.1
= control target key start
LH: loop header
LB: loop body
LE: loop exit
PB: predicated region body
PF: predicated region fallthrough
CT: control target
= control target key end

     0   :  { %s3608_s18 = smov 0   ;;  %s3937_s0 = inlined_call_operand.vmem [shape: bf16[2,1280,32], index: 0, kind: input, shape index: {}]   ;;  %s3938_s1 = inlined_call_operand.vmem [shape: bf16[32,128], index: 1, kind: input, shape index: {}]   ;;  %s3939_s2 = inlined_call_operand.vmem [shape: bf16[128,128], index: 2, kind: input, shape index: {}]   ;;  %s3940_s3 = inlined_call_operand.vmem [shape: bf16[128,128], index: 3, kind: input, shape index: {}]   ;;  %s3941_s4 = inlined_call_operand.vmem [shape: f32[1,128], index: 4, kind: input, shape index: {}]   ;;  %s3942_s5 = inlined_call_operand.vmem [shape: f32[2,1,128], index: 5, kind: output, shape index: {}]  }
   0x1 LB: > { %s2771_s19 = sadd.s32 4294967295, %s3574_s18   ;;  %p2775_p0 = scmp.ge.s32.totalorder %s3574_s18, 1  ;;  %s3574_s18 = sphi %s3608_s18, %s15_s18  }
   0x2   : > { %p187_p1 = scmp.lt.s32.totalorder %s3574_s18, 3 }
   0x4   : > { %p188_p2 = pnand %p2775_p0, %p187_p1 }
   0x5   : > { %v3619_v0 = vld [vmem:[%s3938_s1] sm:$0xff] (!%p188_p2)   ;;  %p213_p3 = scmp.lt.s32.totalorder (!%p188_p2), %s2771_s19, 1  ;;  %v3624_v1 = vld [vmem:[%s3938_s1 + $0x8] sm:$0xff] (!%p188_p2)   ;;  %vm294_vm0 = vcmask (!%p188_p2), 261120   ;;  %vm3577_vm1 = vmmov (!%p188_p2), 0  }
   0x6   : > { %191 = sbr.rel (%p188_p2) target bundleno = 632 (0x278), region = 40  ;;  %3219 = vmatprep.subr.bf16.mxu0 (!%p188_p2), %v3619_v0  ;;  %3239 = vmatprep.subr.bf16.mxu1 (!%p188_p2), %v3619_v0 }
   0x7   : > { %3220 = vmatpush3.bf16.msra.mxu0 (!%p188_p2), %v3619_v0  ;;  %3240 = vmatpush3.bf16.msra.mxu1 (!%p188_p2), %v3619_v0 }
   0x8   : > { %3221 = vmatprep.subr.bf16.mxu0 (!%p188_p2), %v3624_v1  ;;  %3241 = vmatprep.subr.bf16.mxu1 (!%p188_p2), %v3624_v1 }
   0xb   : > { %3222 = vmatpush3.bf16.msra.mxu0 (!%p188_p2), %v3624_v1  ;;  %3242 = vmatpush3.bf16.msra.mxu1 (!%p188_p2), %v3624_v1 }
   0xc   : > { %3259 = vmatprep.subr.bf16.mxu0 (!%p188_p2), %v3619_v0  ;;  %3279 = vmatprep.subr.bf16.mxu1 (!%p188_p2), %v3619_v0 }
   0xd   : > { %s3944_s19 = smov (!%p213_p3, %s2771_s19), 1 }
   0xe   : > { %s3459_s24 = smul.u32 640, %s3944_s19  ;;  %s220_s16 = scalar_lea.vmem %s3942_s5, %s3944_s19 }
  0x10   : > { %s3638_s27 = scalar_lea.vmem %s3937_s0, %s3459_s24 }
  0x11   : > { %v3472_v2 = vld [vmem:[%s3638_s27] sm:$0xff]   ;;  %v3474_v4 = vld [vmem:[%s3638_s27 + $0x8] sm:$0xff]   ;;  %v3476_v6 = vld [vmem:[%s3638_s27 + $0x10] sm:$0xff]  }
  0x12   : > { %v3473_v3 = vld [vmem:[%s3638_s27 + $0x40] sm:$0xff]   ;;  %3223 = vmatprep.mubr.msk.bf16.mxu0 %vm294_vm0, %v3472_v2  ;;  %v3475_v5 = vld [vmem:[%s3638_s27 + $0x48] sm:$0xff]   ;;  %v3477_v7 = vld [vmem:[%s3638_s27 + $0x50] sm:$0xff]  }
  0x13   : > { %3243 = vmatprep.mubr.msk.bf16.mxu1 %vm294_vm0, %v3473_v3  ;;  %3224 = vmatmul.mubr.msk.bf16.vlgmr.msra.gmra.mrb[0].mxu0 %vm294_vm0, %v3474_v4  ;;  %v3478_v8 = vld [vmem:[%s3638_s27 + $0x18] sm:$0xff]   ;;  %v3480_v10 = vld [vmem:[%s3638_s27 + $0x20] sm:$0xff]   ;;  %v3482_v12 = vld [vmem:[%s3638_s27 + $0x28] sm:$0xff]  }
  0x14   : > { %3244 = vmatmul.mubr.msk.bf16.vlgmr.msra.gmra.mrb[0].mxu1 %vm294_vm0, %v3475_v5  ;;  %3260 = vmatpush3.bf16.msra.mxu0 %v3619_v0  ;;  %v3479_v9 = vld [vmem:[%s3638_s27 + $0x58] sm:$0xff]   ;;  %v3481_v11 = vld [vmem:[%s3638_s27 + $0x60] sm:$0xff]   ;;  %v3483_v13 = vld [vmem:[%s3638_s27 + $0x68] sm:$0xff]  }
  0x15   : > { %3280 = vmatpush3.bf16.msra.mxu1 %v3619_v0  ;;  %3227 = vmatprep.mubr.msk.bf16.mxu0 %vm294_vm0, %v3476_v6  ;;  %v3484_v14 = vld [vmem:[%s3638_s27 + $0x30] sm:$0xff]   ;;  %v3486_v16 = vld [vmem:[%s3638_s27 + $0x38] sm:$0xff]   ;;  %v3488_v18 = vld [vmem:[%s3638_s27 + $0x80] sm:$0xff]  }
  0x16   : > { %3247 = vmatprep.mubr.msk.bf16.mxu1 %vm294_vm0, %v3477_v7  ;;  %3261 = vmatprep.subr.bf16.mxu0 %v3624_v1  ;;  %v3485_v15 = vld [vmem:[%s3638_s27 + $0x70] sm:$0xff]   ;;  %v3487_v17 = vld [vmem:[%s3638_s27 + $0x78] sm:$0xff]   ;;  %v3489_v19 = vld [vmem:[%s3638_s27 + $0xc0] sm:$0xff]  }
  0x17   : > { %3281 = vmatprep.subr.bf16.mxu1 %v3624_v1  ;;  %v3490_v20 = vld [vmem:[%s3638_s27 + $0x88] sm:$0xff]   ;;  %v3492_v22 = vld [vmem:[%s3638_s27 + $0x90] sm:$0xff]   ;;  %v3494_v24 = vld [vmem:[%s3638_s27 + $0x98] sm:$0xff]  }
  0x18   : > { %3262 = vmatpush3.bf16.msra.mxu0 %v3624_v1  ;;  %v3491_v21 = vld [vmem:[%s3638_s27 + $0xc8] sm:$0xff]   ;;  %v3493_v23 = vld [vmem:[%s3638_s27 + $0xd0] sm:$0xff]   ;;  %v3495_v25 = vld [vmem:[%s3638_s27 + $0xd8] sm:$0xff]  }
  0x19   : > { %3282 = vmatpush3.bf16.msra.mxu1 %v3624_v1  ;;  %3299 = vmatprep.subr.bf16.mxu0 %v3619_v0  ;;  %v3496_v26 = vld [vmem:[%s3638_s27 + $0xa0] sm:$0xff]   ;;  %v3498_v28 = vld [vmem:[%s3638_s27 + $0xa8] sm:$0xff]   ;;  %v3500_v30 = vld [vmem:[%s3638_s27 + $0xb0] sm:$0xff]  }
  0x1a   : > { %3319 = vmatprep.subr.bf16.mxu1 %v3619_v0  ;;  %v3497_v27 = vld [vmem:[%s3638_s27 + $0xe0] sm:$0xff]   ;;  %v3499_v29 = vld [vmem:[%s3638_s27 + $0xe8] sm:$0xff]   ;;  %v3501_v31 = vld [vmem:[%s3638_s27 + $0xf0] sm:$0xff]  }
  0x1b   : > { %3228 = vmatmul.mubr.msk.bf16.gmra.mrb[4].mxu0 %vm294_vm0, %v3478_v8  ;;  %v3502_v32 = vld [vmem:[%s3638_s27 + $0xb8] sm:$0xff]   ;;  %v3504_v34 = vld [vmem:[%s3638_s27 + $0x100] sm:$0xff]   ;;  %v3506_v36 = vld [vmem:[%s3638_s27 + $0x108] sm:$0xff]  }
  0x1c   : > { %3248 = vmatmul.mubr.msk.bf16.gmra.mrb[4].mxu1 %vm294_vm0, %v3479_v9  ;;  %3231 = vmatprep.mubr.msk.bf16.mxu0 %vm294_vm0, %v3480_v10  ;;  %v3503_v33 = vld [vmem:[%s3638_s27 + $0xf8] sm:$0xff]   ;;  %v3505_v35 = vld [vmem:[%s3638_s27 + $0x140] sm:$0xff]   ;;  %v3507_v37 = vld [vmem:[%s3638_s27 + $0x148] sm:$0xff]  }
  0x1d   : > { %3251 = vmatprep.mubr.msk.bf16.mxu1 %vm294_vm0, %v3481_v11  ;;  %v3508_v38 = vld [vmem:[%s3638_s27 + $0x110] sm:$0xff]   ;;  %v3510_v40 = vld [vmem:[%s3638_s27 + $0x118] sm:$0xff]   ;;  %v3512_v42 = vld [vmem:[%s3638_s27 + $0x120] sm:$0xff]  }
  0x1e   : > { %v3509_v39 = vld [vmem:[%s3638_s27 + $0x150] sm:$0xff]   ;;  %v3511_v41 = vld [vmem:[%s3638_s27 + $0x158] sm:$0xff]   ;;  %v3513_v43 = vld [vmem:[%s3638_s27 + $0x160] sm:$0xff]  }
  0x1f   : > { %v3514_v44 = vld [vmem:[%s3638_s27 + $0x128] sm:$0xff]   ;;  %v3516_v46 = vld [vmem:[%s3638_s27 + $0x130] sm:$0xff]   ;;  %v3518_v48 = vld [vmem:[%s3638_s27 + $0x138] sm:$0xff]  }
  0x20   : > { %v3515_v45 = vld [vmem:[%s3638_s27 + $0x168] sm:$0xff]   ;;  %v3517_v47 = vld [vmem:[%s3638_s27 + $0x170] sm:$0xff]   ;;  %v3519_v49 = vld [vmem:[%s3638_s27 + $0x178] sm:$0xff]  }
  0x21   : > { %v3520_v50 = vld [vmem:[%s3638_s27 + $0x180] sm:$0xff]   ;;  %v3522_v52 = vld [vmem:[%s3638_s27 + $0x188] sm:$0xff]   ;;  %v3524_v54 = vld [vmem:[%s3638_s27 + $0x190] sm:$0xff]  }
  0x22   : > { %v3521_v51 = vld [vmem:[%s3638_s27 + $0x1c0] sm:$0xff]   ;;  %v3523_v53 = vld [vmem:[%s3638_s27 + $0x1c8] sm:$0xff]   ;;  %v3525_v55 = vld [vmem:[%s3638_s27 + $0x1d0] sm:$0xff]  }
  0x23   : > { %3232 = vmatmul.mubr.msk.bf16.gmra.mrb[8].mxu0 %vm294_vm0, %v3482_v12  ;;  %v3526_v56 = vld [vmem:[%s3638_s27 + $0x198] sm:$0xff]   ;;  %v3528_v58 = vld [vmem:[%s3638_s27 + $0x1a0] sm:$0xff]   ;;  %v3530_v60 = vld [vmem:[%s3638_s27 + $0x1a8] sm:$0xff]  }
  0x24   : > { %3252 = vmatmul.mubr.msk.bf16.gmra.mrb[8].mxu1 %vm294_vm0, %v3483_v13  ;;  %3235 = vmatprep.mubr.msk.bf16.mxu0 %vm294_vm0, %v3484_v14  ;;  %v3527_v57 = vld [vmem:[%s3638_s27 + $0x1d8] sm:$0xff]   ;;  %v3529_v59 = vld [vmem:[%s3638_s27 + $0x1e0] sm:$0xff]   ;;  %v3531_v61 = vld [vmem:[%s3638_s27 + $0x1e8] sm:$0xff]  }
  0x25   : > { %3255 = vmatprep.mubr.msk.bf16.mxu1 %vm294_vm0, %v3485_v15  ;;  %v3532_v62 = vld [vmem:[%s3638_s27 + $0x1b0] sm:$0xff]   ;;  %v3536_v2 = vld [vmem:[%s3638_s27 + $0x200] sm:$0xff]   ;;  %v3538_v4 = vld [vmem:[%s3638_s27 + $0x208] sm:$0xff]  }
  0x26   : > { %v3533_v63 = vld [vmem:[%s3638_s27 + $0x1f0] sm:$0xff]   ;;  %v3537_v3 = vld [vmem:[%s3638_s27 + $0x240] sm:$0xff]   ;;  %v3539_v5 = vld [vmem:[%s3638_s27 + $0x248] sm:$0xff]  }
  0x27   : > { %v3540_v6 = vld [vmem:[%s3638_s27 + $0x210] sm:$0xff]   ;;  %v3542_v8 = vld [vmem:[%s3638_s27 + $0x218] sm:$0xff]   ;;  %v3544_v10 = vld [vmem:[%s3638_s27 + $0x220] sm:$0xff]  }
  0x28   : > { %v3541_v7 = vld [vmem:[%s3638_s27 + $0x250] sm:$0xff]   ;;  %v3543_v9 = vld [vmem:[%s3638_s27 + $0x258] sm:$0xff]   ;;  %v3545_v11 = vld [vmem:[%s3638_s27 + $0x260] sm:$0xff]  }
  0x29   : > { %v3546_v12 = vld [vmem:[%s3638_s27 + $0x228] sm:$0xff]   ;;  %v3548_v14 = vld [vmem:[%s3638_s27 + $0x230] sm:$0xff]  }
  0x2a   : > { %v3547_v13 = vld [vmem:[%s3638_s27 + $0x268] sm:$0xff]   ;;  %v3549_v15 = vld [vmem:[%s3638_s27 + $0x270] sm:$0xff]  }
  0x2b   : > { %3236 = vmatmul.mubr.msk.bf16.gmra.mrb[12].mxu0 %vm294_vm0, %v3486_v16  ;;  %v3550_v16 = vld [vmem:[%s3638_s27 + $0x238] sm:$0xff]  }
  0x2c   : > { %3256 = vmatmul.mubr.msk.bf16.gmra.mrb[12].mxu1 %vm294_vm0, %v3487_v17  ;;  %3263 = vmatprep.mubr.msk.bf16.mxu0 %vm294_vm0, %v3488_v18  ;;  %v3551_v17 = vld [vmem:[%s3638_s27 + $0x278] sm:$0xff]  }
  0x2d   : > { %3283 = vmatprep.mubr.msk.bf16.mxu1 %vm294_vm0, %v3489_v19 }
  0x33   : > { %3264 = vmatmul.mubr.msk.bf16.vlgmr.msra.gmra.mrb[16].mxu0 %vm294_vm0, %v3490_v20 }
  0x34   : > { %3284 = vmatmul.mubr.msk.bf16.vlgmr.msra.gmra.mrb[16].mxu1 %vm294_vm0, %v3491_v21  ;;  %3300 = vmatpush3.bf16.msra.mxu0 %v3619_v0 }
  0x35   : > { %3320 = vmatpush3.bf16.msra.mxu1 %v3619_v0  ;;  %3267 = vmatprep.mubr.msk.bf16.mxu0 %vm294_vm0, %v3492_v22 }
  0x36   : > { %3287 = vmatprep.mubr.msk.bf16.mxu1 %vm294_vm0, %v3493_v23  ;;  %3301 = vmatprep.subr.bf16.mxu0 %v3624_v1 }
  0x37   : > { %3321 = vmatprep.subr.bf16.mxu1 %v3624_v1 }
  0x38   : > { %3302 = vmatpush3.bf16.msra.mxu0 %v3624_v1 }
  0x39   : > { %3322 = vmatpush3.bf16.msra.mxu1 %v3624_v1  ;;  %3339 = vmatprep.subr.bf16.mxu0 %v3619_v0 }
  0x3a   : > { %3359 = vmatprep.subr.bf16.mxu1 %v3619_v0 }
  0x3b   : > { %3268 = vmatmul.mubr.msk.bf16.gmra.mrb[20].mxu0 %vm294_vm0, %v3494_v24 }
  0x3c   : > { %3288 = vmatmul.mubr.msk.bf16.gmra.mrb[20].mxu1 %vm294_vm0, %v3495_v25  ;;  %3271 = vmatprep.mubr.msk.bf16.mxu0 %vm294_vm0, %v3496_v26 }
  0x3d   : > { %3291 = vmatprep.mubr.msk.bf16.mxu1 %vm294_vm0, %v3497_v27 }
  0x43   : > { %3272 = vmatmul.mubr.msk.bf16.gmra.mrb[24].mxu0 %vm294_vm0, %v3498_v28 }
  0x44   : > { %3292 = vmatmul.mubr.msk.bf16.gmra.mrb[24].mxu1 %vm294_vm0, %v3499_v29  ;;  %3275 = vmatprep.mubr.msk.bf16.mxu0 %vm294_vm0, %v3500_v30 }
  0x45   : > { %3295 = vmatprep.mubr.msk.bf16.mxu1 %vm294_vm0, %v3501_v31 }
  0x4b   : > { %3276 = vmatmul.mubr.msk.bf16.gmra.mrb[28].mxu0 %vm294_vm0, %v3502_v32 }
  0x4c   : > { %3296 = vmatmul.mubr.msk.bf16.gmra.mrb[28].mxu1 %vm294_vm0, %v3503_v33  ;;  %3303 = vmatprep.mubr.msk.bf16.mxu0 %vm294_vm0, %v3504_v34 }
  0x4d   : > { %3323 = vmatprep.mubr.msk.bf16.mxu1 %vm294_vm0, %v3505_v35 }
  0x53   : > { %3304 = vmatmul.mubr.msk.bf16.vlgmr.msra.gmra.mrb[32].mxu0 %vm294_vm0, %v3506_v36 }
  0x54   : > { %3324 = vmatmul.mubr.msk.bf16.vlgmr.msra.gmra.mrb[32].mxu1 %vm294_vm0, %v3507_v37  ;;  %3340 = vmatpush3.bf16.msra.mxu0 %v3619_v0 }
  0x55   : > { %3360 = vmatpush3.bf16.msra.mxu1 %v3619_v0  ;;  %3307 = vmatprep.mubr.msk.bf16.mxu0 %vm294_vm0, %v3508_v38 }
  0x56   : > { %3327 = vmatprep.mubr.msk.bf16.mxu1 %vm294_vm0, %v3509_v39  ;;  %3341 = vmatprep.subr.bf16.mxu0 %v3624_v1 }
  0x57   : > { %3361 = vmatprep.subr.bf16.mxu1 %v3624_v1 }
  0x58   : > { %3342 = vmatpush3.bf16.msra.mxu0 %v3624_v1 }
  0x59   : > { %3362 = vmatpush3.bf16.msra.mxu1 %v3624_v1  ;;  %3379 = vmatprep.subr.bf16.mxu0 %v3619_v0 }
  0x5a   : > { %3399 = vmatprep.subr.bf16.mxu1 %v3619_v0 }
  0x5b   : > { %3308 = vmatmul.mubr.msk.bf16.gmra.mrb[36].mxu0 %vm294_vm0, %v3510_v40 }
  0x5c   : > { %3328 = vmatmul.mubr.msk.bf16.gmra.mrb[36].mxu1 %vm294_vm0, %v3511_v41  ;;  %3311 = vmatprep.mubr.msk.bf16.mxu0 %vm294_vm0, %v3512_v42 }
  0x5d   : > { %3331 = vmatprep.mubr.msk.bf16.mxu1 %vm294_vm0, %v3513_v43 }
  0x63   : > { %3312 = vmatmul.mubr.msk.bf16.gmra.mrb[40].mxu0 %vm294_vm0, %v3514_v44 }
  0x64   : > { %3332 = vmatmul.mubr.msk.bf16.gmra.mrb[40].mxu1 %vm294_vm0, %v3515_v45  ;;  %3315 = vmatprep.mubr.msk.bf16.mxu0 %vm294_vm0, %v3516_v46 }
  0x65   : > { %3335 = vmatprep.mubr.msk.bf16.mxu1 %vm294_vm0, %v3517_v47 }
  0x6b   : > { %3316 = vmatmul.mubr.msk.bf16.gmra.mrb[44].mxu0 %vm294_vm0, %v3518_v48 }
  0x6c   : > { %3336 = vmatmul.mubr.msk.bf16.gmra.mrb[44].mxu1 %vm294_vm0, %v3519_v49  ;;  %3343 = vmatprep.mubr.msk.bf16.mxu0 %vm294_vm0, %v3520_v50 }
  0x6d   : > { %3363 = vmatprep.mubr.msk.bf16.mxu1 %vm294_vm0, %v3521_v51 }
  0x73   : > { %3344 = vmatmul.mubr.msk.bf16.vlgmr.msra.gmra.mrb[48].mxu0 %vm294_vm0, %v3522_v52 }
  0x74   : > { %3364 = vmatmul.mubr.msk.bf16.vlgmr.msra.gmra.mrb[48].mxu1 %vm294_vm0, %v3523_v53  ;;  %3380 = vmatpush3.bf16.msra.mxu0 %v3619_v0 }
  0x75   : > { %3400 = vmatpush3.bf16.msra.mxu1 %v3619_v0  ;;  %3347 = vmatprep.mubr.msk.bf16.mxu0 %vm294_vm0, %v3524_v54  ;;  %v3534_v0 = vld [vmem:[%s3638_s27 + $0x1b8] sm:$0xff]  }
  0x76   : > { %3367 = vmatprep.mubr.msk.bf16.mxu1 %vm294_vm0, %v3525_v55  ;;  %3381 = vmatprep.subr.bf16.mxu0 %v3624_v1 }
  0x77   : > { %3401 = vmatprep.subr.bf16.mxu1 %v3624_v1 }
  0x78   : > { %3382 = vmatpush3.bf16.msra.mxu0 %v3624_v1 }
  0x79   : > { %3402 = vmatpush3.bf16.msra.mxu1 %v3624_v1  ;;  %v3535_v1 = vld [vmem:[%s3638_s27 + $0x1f8] sm:$0xff]  }
  0x7b   : > { %3348 = vmatmul.mubr.msk.bf16.gmra.mrb[52].mxu0 %vm294_vm0, %v3526_v56 }
  0x7c   : > { %3368 = vmatmul.mubr.msk.bf16.gmra.mrb[52].mxu1 %vm294_vm0, %v3527_v57  ;;  %3351 = vmatprep.mubr.msk.bf16.mxu0 %vm294_vm0, %v3528_v58 }
  0x7d   : > { %3371 = vmatprep.mubr.msk.bf16.mxu1 %vm294_vm0, %v3529_v59 }
  0x83   : > { %3352 = vmatmul.mubr.msk.bf16.gmra.mrb[56].mxu0 %vm294_vm0, %v3530_v60 }
  0x84   : > { %3372 = vmatmul.mubr.msk.bf16.gmra.mrb[56].mxu1 %vm294_vm0, %v3531_v61  ;;  %3355 = vmatprep.mubr.msk.bf16.mxu0 %vm294_vm0, %v3532_v62 }
  0x85   : > { %3375 = vmatprep.mubr.msk.bf16.mxu1 %vm294_vm0, %v3533_v63 }
  0x8b   : > { %3356 = vmatmul.mubr.msk.bf16.gmra.mrb[60].mxu0 %vm294_vm0, %v3534_v0 }
  0x8c   : > { %3376 = vmatmul.mubr.msk.bf16.gmra.mrb[60].mxu1 %vm294_vm0, %v3535_v1  ;;  %3383 = vmatprep.mubr.msk.bf16.mxu0 %vm294_vm0, %v3536_v2 }
  0x8d   : > { %3403 = vmatprep.mubr.msk.bf16.mxu1 %vm294_vm0, %v3537_v3 }
  0x93   : > { %3384 = vmatmul.mubr.msk.bf16.vlgmr.msra.gmra.mrb[64].mxu0 %vm294_vm0, %v3538_v4 }
  0x94   : > { %3404 = vmatmul.mubr.msk.bf16.vlgmr.msra.gmra.mrb[64].mxu1 %vm294_vm0, %v3539_v5  ;;  %3387 = vmatprep.mubr.msk.bf16.mxu0 %vm294_vm0, %v3540_v6 }
  0x95   : > { %3407 = vmatprep.mubr.msk.bf16.mxu1 %vm294_vm0, %v3541_v7 }
  0x9b   : > { %3388 = vmatmul.mubr.msk.bf16.gmra.mrb[68].mxu0 %vm294_vm0, %v3542_v8 }
  0x9c   : > { %3408 = vmatmul.mubr.msk.bf16.gmra.mrb[68].mxu1 %vm294_vm0, %v3543_v9  ;;  %3391 = vmatprep.mubr.msk.bf16.mxu0 %vm294_vm0, %v3544_v10 }
  0x9d   : > { %3411 = vmatprep.mubr.msk.bf16.mxu1 %vm294_vm0, %v3545_v11 }
  0xa3   : > { %3392 = vmatmul.mubr.msk.bf16.gmra.mrb[72].mxu0 %vm294_vm0, %v3546_v12 }
  0xa4   : > { %3412 = vmatmul.mubr.msk.bf16.gmra.mrb[72].mxu1 %vm294_vm0, %v3547_v13  ;;  %3395 = vmatprep.mubr.msk.bf16.mxu0 %vm294_vm0, %v3548_v14 }
  0xa5   : > { %3415 = vmatprep.mubr.msk.bf16.mxu1 %vm294_vm0, %v3549_v15 }
  0xab   : > { %3396 = vmatmul.mubr.msk.bf16.gmra.mrb[76].mxu0 %vm294_vm0, %v3550_v16 }
  0xac   : > { %3416 = vmatmul.mubr.msk.bf16.gmra.mrb[76].mxu1 %vm294_vm0, %v3551_v17 }
  0xe6   : > { %v3225_v18 = vpop.f32.mrb[0].mxu0 }
  0xe7   : > { %v3245_v19 = vpop.f32.mrb[0].mxu1  ;;  %v353_v20 = vpop.f32.mrb[1].mxu0  ;;  %v418_v30 = vmax.f32 %v3225_v18, 0.0 }
  0xe8   : > { %v579_v21 = vpop.f32.mrb[1].mxu1  ;;  %v3226_v22 = vpop.f32.mrb[2].mxu0  ;;  %v416_v26 = vmax.f32 %v353_v20, 0.0  ;;  %v644_v32 = vmax.f32 %v3245_v19, 0.0 }
  0xe9   : > { %v642_v23 = vmax.f32 %v579_v21, 0.0  ;;  %v3246_v24 = vpop.f32.mrb[2].mxu1  ;;  %v356_v25 = vpop.f32.mrb[3].mxu0  ;;  %v419_v34 = vmax.f32 %v3226_v22, 0.0 }
  0xea   : > { %v417_v27 = vmax.f32 %v356_v25, 0.0  ;;  %v582_v28 = vpop.f32.mrb[3].mxu1  ;;  %v645_v37 = vmax.f32 %v3246_v24, 0.0 }
  0xeb   : > { %v643_v29 = vmax.f32 %v582_v28, 0.0 }
  0xec   : > { %v432_v31 = vadd.f32 %v417_v27, %v416_v26 }
  0xed   : > { %v658_v33 = vadd.f32 %v643_v29, %v642_v23 }
  0xee   : > { %v433_v35 = vadd.f32 %v432_v31, %v418_v30  ;;  %v3229_v36 = vpop.f32.mrb[4].mxu0 }
  0xef   : > { %v659_v38 = vadd.f32 %v658_v33, %v644_v32  ;;  %v422_v39 = vmax.f32 %v3229_v36, 0.0  ;;  %v3249_v40 = vpop.f32.mrb[4].mxu1  ;;  %v369_v41 = vpop.f32.mrb[5].mxu0 }
  0xf0   : > { %v648_v42 = vmax.f32 %v3249_v40, 0.0  ;;  %v420_v43 = vmax.f32 %v369_v41, 0.0  ;;  %v434_v44 = vadd.f32 %v433_v35, %v419_v34  ;;  %v595_v45 = vpop.f32.mrb[5].mxu1  ;;  %v3230_v46 = vpop.f32.mrb[6].mxu0 }
  0xf1   : > { %v450_v47 = vmax.f32 %v418_v30, %v422_v39  ;;  %v646_v48 = vmax.f32 %v595_v45, 0.0  ;;  %v660_v49 = vadd.f32 %v659_v38, %v645_v37  ;;  %v423_v50 = vmax.f32 %v3230_v46, 0.0  ;;  %v3250_v51 = vpop.f32.mrb[6].mxu1  ;;  %v372_v52 = vpop.f32.mrb[7].mxu0 }
  0xf2   : > { %v676_v53 = vmax.f32 %v644_v32, %v648_v42  ;;  %v435_v54 = vadd.f32 %v434_v44, %v420_v43  ;;  %v448_v55 = vmax.f32 %v416_v26, %v420_v43  ;;  %v649_v56 = vmax.f32 %v3250_v51, 0.0  ;;  %v598_v57 = vpop.f32.mrb[7].mxu1  ;;  %v3553_v43 = vld [vmem:[%s3940_s3] sm:$0xff]  }
  0xf3   : > { %v661_v58 = vadd.f32 %v660_v49, %v646_v48  ;;  %v674_v59 = vmax.f32 %v642_v23, %v646_v48  ;;  %v451_v60 = vmax.f32 %v419_v34, %v423_v50  ;;  %v421_v61 = vmax.f32 %v372_v52, 0.0  ;;  %v3552_v34 = vld [vmem:[%s3939_s2] sm:$0xff]  }
  0xf4   : > { %v677_v62 = vmax.f32 %v645_v37, %v649_v56  ;;  %v647_v63 = vmax.f32 %v598_v57, 0.0  ;;  %v3576_v38 = vmov 0.0  }
  0xf5   : > { %v436_v0 = vadd.f32 %v435_v54, %v421_v61  ;;  %v449_v1 = vmax.f32 %v417_v27, %v421_v61  ;;  %3439 = vmatprep.subr.bf16.mxu1 %v3576_v38  ;;  %3419 = vmatprep.subr.bf16.mxu0 %v3576_v38 }
  0xf6   : > { %v662_v2 = vadd.f32 %v661_v58, %v647_v63  ;;  %v675_v3 = vmax.f32 %v643_v29, %v647_v63  ;;  %v3233_v4 = vpop.f32.mrb[8].mxu0  ;;  %3440 = vmatpush3.bf16.msra.mxu1 %v3552_v34  ;;  %3420 = vmatpush3.bf16.msra.mxu0 %v3553_v43  ;;  %v3560_v43 = vld [vmem:[%s3939_s2 + $0x20] sm:$0xff]  }
  0xf7   : > { %v437_v5 = vadd.f32 %v436_v0, %v422_v39  ;;  %v426_v6 = vmax.f32 %v3233_v4, 0.0  ;;  %v3253_v7 = vpop.f32.mrb[8].mxu1  ;;  %v385_v8 = vpop.f32.mrb[9].mxu0  ;;  %3441 = vmatprep.subr.bf16.mxu1 %v3576_v38  ;;  %3421 = vmatprep.subr.bf16.mxu0 %v3576_v38 }
  0xf8   : > { %v663_v9 = vadd.f32 %v662_v2, %v648_v42  ;;  %v652_v10 = vmax.f32 %v3253_v7, 0.0  ;;  %v424_v11 = vmax.f32 %v385_v8, 0.0  ;;  %v611_v12 = vpop.f32.mrb[9].mxu1  ;;  %v3234_v13 = vpop.f32.mrb[10].mxu0  ;;  %v3556_v8 = vld [vmem:[%s3939_s2 + $0x10] sm:$0xff]   ;;  %3455 = vmatprep.mubr.msk.bf16.mxu1 %vm3577_vm1, %v3576_v38  ;;  %3435 = vmatprep.mubr.msk.bf16.mxu0 %vm3577_vm1, %v3576_v38 }
  0xf9   : > { %v454_v14 = vmax.f32 %v450_v47, %v426_v6  ;;  %v438_v15 = vadd.f32 %v437_v5, %v423_v50  ;;  %v650_v16 = vmax.f32 %v611_v12, 0.0  ;;  %v427_v17 = vmax.f32 %v3234_v13, 0.0  ;;  %v3254_v18 = vpop.f32.mrb[10].mxu1  ;;  %v388_v19 = vpop.f32.mrb[11].mxu0 }
  0xfa   : > { %v680_v20 = vmax.f32 %v676_v53, %v652_v10  ;;  %v452_v21 = vmax.f32 %v448_v55, %v424_v11  ;;  %v664_v22 = vadd.f32 %v663_v9, %v649_v56  ;;  %v653_v23 = vmax.f32 %v3254_v18, 0.0  ;;  %v614_v24 = vpop.f32.mrb[11].mxu1  ;;  %v3554_v55 = vld [vmem:[%s3939_s2 + $0x8] sm:$0xff]  }
  0xfb   : > { %v439_v25 = vadd.f32 %v438_v15, %v424_v11  ;;  %v678_v26 = vmax.f32 %v674_v59, %v650_v16  ;;  %v455_v27 = vmax.f32 %v451_v60, %v427_v17  ;;  %v425_v28 = vmax.f32 %v388_v19, 0.0  ;;  %3442 = vmatpush3.bf16.msra.mxu1 %v3554_v55 }
  0xfc   : > { %v665_v29 = vadd.f32 %v664_v22, %v650_v16  ;;  %v681_v30 = vmax.f32 %v677_v62, %v653_v23  ;;  %v651_v31 = vmax.f32 %v614_v24, 0.0  ;;  %3443 = vmatprep.subr.bf16.mxu1 %v3576_v38 }
  0xfd   : > { %v440_v32 = vadd.f32 %v439_v25, %v425_v28  ;;  %v453_v33 = vmax.f32 %v449_v1, %v425_v28  ;;  %v3555_v1 = vld [vmem:[%s3940_s3 + $0x8] sm:$0xff]  }
  0xfe   : > { %v666_v35 = vadd.f32 %v665_v29, %v651_v31  ;;  %v679_v36 = vmax.f32 %v675_v3, %v651_v31  ;;  %v3237_v37 = vpop.f32.mrb[12].mxu0  ;;  %3422 = vmatpush3.bf16.msra.mxu0 %v3555_v1 }
  0xff   : > { %v441_v39 = vadd.f32 %v440_v32, %v426_v6  ;;  %v430_v40 = vmax.f32 %v3237_v37, 0.0  ;;  %v3257_v41 = vpop.f32.mrb[12].mxu1  ;;  %v401_v42 = vpop.f32.mrb[13].mxu0  ;;  %3423 = vmatprep.subr.bf16.mxu0 %v3576_v38  ;;  %3444 = vmatpush3.bf16.msra.mxu1 %v3556_v8 }
 0x100   : > { %v667_v44 = vadd.f32 %v666_v35, %v652_v10  ;;  %v656_v45 = vmax.f32 %v3257_v41, 0.0  ;;  %v428_v46 = vmax.f32 %v401_v42, 0.0  ;;  %v627_v47 = vpop.f32.mrb[13].mxu1  ;;  %v3238_v48 = vpop.f32.mrb[14].mxu0  ;;  %3445 = vmatprep.subr.bf16.mxu1 %v3576_v38  ;;  %v3559_v35 = vld [vmem:[%s3940_s3 + $0x18] sm:$0xff]  }
 0x101   : > { %v458_v49 = vmax.f32 %v454_v14, %v430_v40  ;;  %v442_v50 = vadd.f32 %v441_v39, %v427_v17  ;;  %v654_v51 = vmax.f32 %v627_v47, 0.0  ;;  %v431_v52 = vmax.f32 %v3238_v48, 0.0  ;;  %v3258_v53 = vpop.f32.mrb[14].mxu1  ;;  %v404_v54 = vpop.f32.mrb[15].mxu0  ;;  %v3557_v17 = vld [vmem:[%s3940_s3 + $0x10] sm:$0xff]  }
 0x102   : > { %v684_v56 = vmax.f32 %v680_v20, %v656_v45  ;;  %v456_v57 = vmax.f32 %v452_v21, %v428_v46  ;;  %v668_v58 = vadd.f32 %v667_v44, %v653_v23  ;;  %v657_v59 = vmax.f32 %v3258_v53, 0.0  ;;  %v630_v60 = vpop.f32.mrb[15].mxu1  ;;  %3424 = vmatpush3.bf16.msra.mxu0 %v3557_v17 }
 0x103   : > { %v443_v61 = vadd.f32 %v442_v50, %v428_v46  ;;  %v682_v62 = vmax.f32 %v678_v26, %v654_v51  ;;  %v459_v63 = vmax.f32 %v455_v27, %v431_v52  ;;  %v429_v0 = vmax.f32 %v404_v54, 0.0  ;;  %v3558_v27 = vld [vmem:[%s3939_s2 + $0x18] sm:$0xff]   ;;  %3425 = vmatprep.subr.bf16.mxu0 %v3576_v38 }
 0x104   : > { %v669_v2 = vadd.f32 %v668_v58, %v654_v51  ;;  %v685_v3 = vmax.f32 %v681_v30, %v657_v59  ;;  %v655_v4 = vmax.f32 %v630_v60, 0.0  ;;  %3446 = vmatpush3.bf16.msra.mxu1 %v3558_v27 }
 0x105   : > { %v461_v5 = vmax.f32 %v458_v49, %v459_v63  ;;  %v444_v6 = vadd.f32 %v443_v61, %v429_v0  ;;  %v457_v7 = vmax.f32 %v453_v33, %v429_v0  ;;  %3447 = vmatprep.subr.bf16.mxu1 %v3576_v38  ;;  %v3562_v0 = vld [vmem:[%s3939_s2 + $0x28] sm:$0xff]  }
 0x106   : > { %v687_v9 = vmax.f32 %v684_v56, %v685_v3  ;;  %v670_v10 = vadd.f32 %v669_v2, %v655_v4  ;;  %v683_v11 = vmax.f32 %v679_v36, %v655_v4  ;;  %v3265_v12 = vpop.f32.mrb[16].mxu0  ;;  %3426 = vmatpush3.bf16.msra.mxu0 %v3559_v35 }
 0x107   : > { %v445_v13 = vadd.f32 %v444_v6, %v430_v40  ;;  %v460_v14 = vmax.f32 %v456_v57, %v457_v7  ;;  %v3285_v15 = vpop.f32.mrb[16].mxu1  ;;  %v805_v16 = vpop.f32.mrb[17].mxu0  ;;  %v870_v37 = vmax.f32 %v3265_v12, 0.0  ;;  %3427 = vmatprep.subr.bf16.mxu0 %v3576_v38 }
 0x108   : > { %v671_v18 = vadd.f32 %v670_v10, %v656_v45  ;;  %v686_v19 = vmax.f32 %v682_v62, %v683_v11  ;;  %v1031_v20 = vpop.f32.mrb[17].mxu1  ;;  %v3266_v21 = vpop.f32.mrb[18].mxu0  ;;  %v868_v30 = vmax.f32 %v805_v16, 0.0  ;;  %v1096_v41 = vmax.f32 %v3285_v15, 0.0  ;;  %3448 = vmatpush3.bf16.msra.mxu1 %v3560_v43  ;;  %v3563_v10 = vld [vmem:[%s3940_s3 + $0x28] sm:$0xff]   ;;  %v3564_v15 = vld [vmem:[%s3939_s2 + $0x30] sm:$0xff]  }
 0x109   : > { %v446_v22 = vadd.f32 %v445_v13, %v431_v52  ;;  %v462_v23 = vmax.f32 %v460_v14, %v461_v5  ;;  %v1094_v24 = vmax.f32 %v1031_v20, 0.0  ;;  %v3286_v25 = vpop.f32.mrb[18].mxu1  ;;  %v3859_v26 = vpop.f32.mrb[19].mxu0  ;;  %v871_v44 = vmax.f32 %v3266_v21, 0.0  ;;  %v3561_v52 = vld [vmem:[%s3940_s3 + $0x20] sm:$0xff]   ;;  %3449 = vmatprep.subr.bf16.mxu1 %v3576_v38 }
 0x10a   : > { %v672_v28 = vadd.f32 %v671_v18, %v657_v59  ;;  %v688_v29 = vmax.f32 %v686_v19, %v687_v9  ;;  %v869_v31 = vmax.f32 %v3859_v26, 0.0  ;;  %v1034_v32 = vpop.f32.mrb[19].mxu1  ;;  %v1097_v47 = vmax.f32 %v3286_v25, 0.0  ;;  %3428 = vmatpush3.bf16.msra.mxu0 %v3561_v52 }
 0x10b   : > { %v463_v33 = vmax.f32 %v462_v23, 0.0  ;;  %v1095_v34 = vmax.f32 %v1034_v32, 0.0  ;;  %3429 = vmatprep.subr.bf16.mxu0 %v3576_v38  ;;  %v3565_v23 = vld [vmem:[%s3940_s3 + $0x30] sm:$0xff]  }
 0x10c   : > { %v3869_v36 = vadd.f32 %v672_v28, %v446_v22  ;;  %v884_v39 = vadd.f32 %v869_v31, %v868_v30  ;;  %3450 = vmatpush3.bf16.msra.mxu1 %v3562_v0 }
 0x10d   : > { %v3872_v40 = vmax.f32 %v463_v33, %v688_v29  ;;  %v1110_v42 = vadd.f32 %v1095_v34, %v1094_v24  ;;  %3451 = vmatprep.subr.bf16.mxu1 %v3576_v38 }
 0x10e   : > { %v885_v45 = vadd.f32 %v884_v39, %v870_v37  ;;  %v3269_v46 = vpop.f32.mrb[20].mxu0  ;;  %3430 = vmatpush3.bf16.msra.mxu0 %v3563_v10 }
 0x10f   : > { %v1111_v48 = vadd.f32 %v1110_v42, %v1096_v41  ;;  %v874_v49 = vmax.f32 %v3269_v46, 0.0  ;;  %v3289_v50 = vpop.f32.mrb[20].mxu1  ;;  %v821_v51 = vpop.f32.mrb[21].mxu0  ;;  %3431 = vmatprep.subr.bf16.mxu0 %v3576_v38 }
 0x110   : > { %v1100_v53 = vmax.f32 %v3289_v50, 0.0  ;;  %v872_v54 = vmax.f32 %v821_v51, 0.0  ;;  %v886_v55 = vadd.f32 %v885_v45, %v871_v44  ;;  %v1047_v56 = vpop.f32.mrb[21].mxu1  ;;  %v3270_v57 = vpop.f32.mrb[22].mxu0  ;;  %3452 = vmatpush3.bf16.msra.mxu1 %v3564_v15 }
 0x111   : > { %v902_v58 = vmax.f32 %v870_v37, %v874_v49  ;;  %v1098_v59 = vmax.f32 %v1047_v56, 0.0  ;;  %v1112_v60 = vadd.f32 %v1111_v48, %v1097_v47  ;;  %v875_v61 = vmax.f32 %v3270_v57, 0.0  ;;  %v3290_v62 = vpop.f32.mrb[22].mxu1  ;;  %v824_v63 = vpop.f32.mrb[23].mxu0  ;;  %3453 = vmatprep.subr.bf16.mxu1 %v3576_v38  ;;  %v3567_v37 = vld [vmem:[%s3940_s3 + $0x38] sm:$0xff]  }
 0x112   : > { %v1128_v1 = vmax.f32 %v1096_v41, %v1100_v53  ;;  %v887_v2 = vadd.f32 %v886_v55, %v872_v54  ;;  %v900_v3 = vmax.f32 %v868_v30, %v872_v54  ;;  %v1101_v4 = vmax.f32 %v3290_v62, 0.0  ;;  %v1050_v5 = vpop.f32.mrb[23].mxu1  ;;  %3432 = vmatpush3.bf16.msra.mxu0 %v3565_v23 }
 0x113   : > { %v1113_v6 = vadd.f32 %v1112_v60, %v1098_v59  ;;  %v1126_v7 = vmax.f32 %v1094_v24, %v1098_v59  ;;  %v903_v8 = vmax.f32 %v871_v44, %v875_v61  ;;  %v873_v9 = vmax.f32 %v824_v63, 0.0  ;;  %v3566_v24 = vld [vmem:[%s3939_s2 + $0x38] sm:$0xff]   ;;  %3433 = vmatprep.subr.bf16.mxu0 %v3576_v38 }
 0x114   : > { %v1129_v11 = vmax.f32 %v1097_v47, %v1101_v4  ;;  %v1099_v12 = vmax.f32 %v1050_v5, 0.0  ;;  %3454 = vmatpush3.bf16.msra.mxu1 %v3566_v24 }
 0x115   : > { %v888_v13 = vadd.f32 %v887_v2, %v873_v9  ;;  %v901_v14 = vmax.f32 %v869_v31, %v873_v9 }
 0x116   : > { %v1114_v16 = vadd.f32 %v1113_v6, %v1099_v12  ;;  %v1127_v17 = vmax.f32 %v1095_v34, %v1099_v12  ;;  %v3273_v18 = vpop.f32.mrb[24].mxu0  ;;  %3434 = vmatpush3.bf16.msra.mxu0 %v3567_v37 }
 0x117   : > { %v889_v19 = vadd.f32 %v888_v13, %v874_v49  ;;  %v878_v20 = vmax.f32 %v3273_v18, 0.0  ;;  %v3293_v21 = vpop.f32.mrb[24].mxu1  ;;  %v837_v22 = vpop.f32.mrb[25].mxu0 }
 0x118   : > { %v1115_v25 = vadd.f32 %v1114_v16, %v1100_v53  ;;  %v1104_v26 = vmax.f32 %v3293_v21, 0.0  ;;  %v876_v27 = vmax.f32 %v837_v22, 0.0  ;;  %v1063_v28 = vpop.f32.mrb[25].mxu1  ;;  %v3274_v29 = vpop.f32.mrb[26].mxu0 }
 0x119   : > { %v906_v30 = vmax.f32 %v902_v58, %v878_v20  ;;  %v890_v31 = vadd.f32 %v889_v19, %v875_v61  ;;  %v1102_v32 = vmax.f32 %v1063_v28, 0.0  ;;  %v879_v33 = vmax.f32 %v3274_v29, 0.0  ;;  %v3294_v34 = vpop.f32.mrb[26].mxu1  ;;  %v840_v35 = vpop.f32.mrb[27].mxu0 }
 0x11a   : > { %v1132_v39 = vmax.f32 %v1128_v1, %v1104_v26  ;;  %v904_v41 = vmax.f32 %v900_v3, %v876_v27  ;;  %v1116_v42 = vadd.f32 %v1115_v25, %v1101_v4  ;;  %v1105_v43 = vmax.f32 %v3294_v34, 0.0  ;;  %v1066_v44 = vpop.f32.mrb[27].mxu1 }
 0x11b   : > { %v891_v45 = vadd.f32 %v890_v31, %v876_v27  ;;  %v1130_v46 = vmax.f32 %v1126_v7, %v1102_v32  ;;  %v907_v47 = vmax.f32 %v903_v8, %v879_v33  ;;  %v877_v48 = vmax.f32 %v840_v35, 0.0 }
 0x11c   : > { %v1117_v49 = vadd.f32 %v1116_v42, %v1102_v32  ;;  %v1133_v50 = vmax.f32 %v1129_v11, %v1105_v43  ;;  %v1103_v51 = vmax.f32 %v1066_v44, 0.0 }
 0x11d   : > { %v892_v52 = vadd.f32 %v891_v45, %v877_v48  ;;  %v905_v53 = vmax.f32 %v901_v14, %v877_v48 }
 0x11e   : > { %v1118_v54 = vadd.f32 %v1117_v49, %v1103_v51  ;;  %v1131_v55 = vmax.f32 %v1127_v17, %v1103_v51  ;;  %v3277_v56 = vpop.f32.mrb[28].mxu0 }
 0x11f   : > { %v893_v57 = vadd.f32 %v892_v52, %v878_v20  ;;  %v882_v58 = vmax.f32 %v3277_v56, 0.0  ;;  %v3297_v59 = vpop.f32.mrb[28].mxu1  ;;  %v853_v60 = vpop.f32.mrb[29].mxu0 }
 0x120   : > { %v1119_v61 = vadd.f32 %v1118_v54, %v1104_v26  ;;  %v1108_v38 = vmax.f32 %v3297_v59, 0.0  ;;  %v880_v62 = vmax.f32 %v853_v60, 0.0  ;;  %v1079_v63 = vpop.f32.mrb[29].mxu1  ;;  %v3278_v0 = vpop.f32.mrb[30].mxu0 }
 0x121   : > { %v910_v1 = vmax.f32 %v906_v30, %v882_v58  ;;  %v894_v2 = vadd.f32 %v893_v57, %v879_v33  ;;  %v1106_v3 = vmax.f32 %v1079_v63, 0.0  ;;  %v883_v4 = vmax.f32 %v3278_v0, 0.0  ;;  %v3298_v5 = vpop.f32.mrb[30].mxu1  ;;  %v856_v6 = vpop.f32.mrb[31].mxu0 }
 0x122   : > { %v1136_v7 = vmax.f32 %v1132_v39, %v1108_v38  ;;  %v908_v8 = vmax.f32 %v904_v41, %v880_v62  ;;  %v1120_v9 = vadd.f32 %v1119_v61, %v1105_v43  ;;  %v1109_v10 = vmax.f32 %v3298_v5, 0.0  ;;  %v1082_v11 = vpop.f32.mrb[31].mxu1 }
 0x123   : > { %v895_v12 = vadd.f32 %v894_v2, %v880_v62  ;;  %v1134_v13 = vmax.f32 %v1130_v46, %v1106_v3  ;;  %v911_v14 = vmax.f32 %v907_v47, %v883_v4  ;;  %v881_v15 = vmax.f32 %v856_v6, 0.0 }
 0x124   : > { %v1121_v16 = vadd.f32 %v1120_v9, %v1106_v3  ;;  %v1137_v17 = vmax.f32 %v1133_v50, %v1109_v10  ;;  %v1107_v18 = vmax.f32 %v1082_v11, 0.0 }
 0x125   : > { %v913_v19 = vmax.f32 %v910_v1, %v911_v14  ;;  %v896_v20 = vadd.f32 %v895_v12, %v881_v15  ;;  %v909_v21 = vmax.f32 %v905_v53, %v881_v15 }
 0x126   : > { %v1139_v22 = vmax.f32 %v1136_v7, %v1137_v17  ;;  %v1122_v23 = vadd.f32 %v1121_v16, %v1107_v18  ;;  %v1135_v24 = vmax.f32 %v1131_v55, %v1107_v18  ;;  %v3305_v25 = vpop.f32.mrb[32].mxu0 }
 0x127   : > { %v897_v26 = vadd.f32 %v896_v20, %v882_v58  ;;  %v912_v27 = vmax.f32 %v908_v8, %v909_v21  ;;  %v3325_v28 = vpop.f32.mrb[32].mxu1  ;;  %v1257_v29 = vpop.f32.mrb[33].mxu0  ;;  %v1322_v50 = vmax.f32 %v3305_v25, 0.0 }
 0x128   : > { %v1123_v30 = vadd.f32 %v1122_v23, %v1108_v38  ;;  %v1138_v31 = vmax.f32 %v1134_v13, %v1135_v24  ;;  %v1483_v32 = vpop.f32.mrb[33].mxu1  ;;  %v3306_v33 = vpop.f32.mrb[34].mxu0  ;;  %v1320_v44 = vmax.f32 %v1257_v29, 0.0  ;;  %v1548_v54 = vmax.f32 %v3325_v28, 0.0 }
 0x129   : > { %v898_v34 = vadd.f32 %v897_v26, %v883_v4  ;;  %v914_v35 = vmax.f32 %v912_v27, %v913_v19  ;;  %v1546_v37 = vmax.f32 %v1483_v32, 0.0  ;;  %v3326_v39 = vpop.f32.mrb[34].mxu1  ;;  %v1260_v41 = vpop.f32.mrb[35].mxu0  ;;  %v1323_v56 = vmax.f32 %v3306_v33, 0.0 }
 0x12a   : > { %v1124_v42 = vadd.f32 %v1123_v30, %v1109_v10  ;;  %v1140_v43 = vmax.f32 %v1138_v31, %v1139_v22  ;;  %v1321_v45 = vmax.f32 %v1260_v41, 0.0  ;;  %v1486_v46 = vpop.f32.mrb[35].mxu1  ;;  %v1549_v59 = vmax.f32 %v3326_v39, 0.0 }
 0x12b   : > { %v899_v47 = vadd.f32 %v898_v34, %v3869_v36  ;;  %v915_v48 = vmax.f32 %v3872_v40, %v914_v35  ;;  %v1547_v49 = vmax.f32 %v1486_v46, 0.0 }
 0x12c   : > { %v1336_v51 = vadd.f32 %v1321_v45, %v1320_v44 }
 0x12d   : > { %v3909_v52 = vadd.f32 %v1124_v42, %v899_v47  ;;  %v3911_v53 = vmax.f32 %v915_v48, %v1140_v43  ;;  %v1562_v55 = vadd.f32 %v1547_v49, %v1546_v37 }
 0x12e   : > { %v1337_v57 = vadd.f32 %v1336_v51, %v1322_v50  ;;  %v3309_v58 = vpop.f32.mrb[36].mxu0 }
 0x12f   : > { %v1563_v60 = vadd.f32 %v1562_v55, %v1548_v54  ;;  %v1326_v61 = vmax.f32 %v3309_v58, 0.0  ;;  %v3329_v38 = vpop.f32.mrb[36].mxu1  ;;  %v1273_v62 = vpop.f32.mrb[37].mxu0 }
 0x130   : > { %v1552_v36 = vmax.f32 %v3329_v38, 0.0  ;;  %v1324_v63 = vmax.f32 %v1273_v62, 0.0  ;;  %v1338_v40 = vadd.f32 %v1337_v57, %v1323_v56  ;;  %v1499_v0 = vpop.f32.mrb[37].mxu1  ;;  %v3310_v1 = vpop.f32.mrb[38].mxu0 }
 0x131   : > { %v1354_v2 = vmax.f32 %v1322_v50, %v1326_v61  ;;  %v1550_v3 = vmax.f32 %v1499_v0, 0.0  ;;  %v1564_v4 = vadd.f32 %v1563_v60, %v1549_v59  ;;  %v1327_v5 = vmax.f32 %v3310_v1, 0.0  ;;  %v3330_v6 = vpop.f32.mrb[38].mxu1  ;;  %v1276_v7 = vpop.f32.mrb[39].mxu0 }
 0x132   : > { %v1580_v8 = vmax.f32 %v1548_v54, %v1552_v36  ;;  %v1339_v9 = vadd.f32 %v1338_v40, %v1324_v63  ;;  %v1352_v10 = vmax.f32 %v1320_v44, %v1324_v63  ;;  %v1553_v11 = vmax.f32 %v3330_v6, 0.0  ;;  %v1502_v12 = vpop.f32.mrb[39].mxu1 }
 0x133   : > { %v1565_v13 = vadd.f32 %v1564_v4, %v1550_v3  ;;  %v1578_v14 = vmax.f32 %v1546_v37, %v1550_v3  ;;  %v1355_v15 = vmax.f32 %v1323_v56, %v1327_v5  ;;  %v1325_v16 = vmax.f32 %v1276_v7, 0.0 }
 0x134   : > { %v1581_v17 = vmax.f32 %v1549_v59, %v1553_v11  ;;  %v1551_v18 = vmax.f32 %v1502_v12, 0.0 }
 0x135   : > { %v1340_v19 = vadd.f32 %v1339_v9, %v1325_v16  ;;  %v1353_v20 = vmax.f32 %v1321_v45, %v1325_v16 }
 0x136   : > { %v1566_v21 = vadd.f32 %v1565_v13, %v1551_v18  ;;  %v1579_v22 = vmax.f32 %v1547_v49, %v1551_v18  ;;  %v3313_v23 = vpop.f32.mrb[40].mxu0 }
 0x137   : > { %v1341_v24 = vadd.f32 %v1340_v19, %v1326_v61  ;;  %v1330_v25 = vmax.f32 %v3313_v23, 0.0  ;;  %v3333_v26 = vpop.f32.mrb[40].mxu1  ;;  %v1289_v27 = vpop.f32.mrb[41].mxu0 }
 0x138   : > { %v1567_v28 = vadd.f32 %v1566_v21, %v1552_v36  ;;  %v1556_v29 = vmax.f32 %v3333_v26, 0.0  ;;  %v1328_v30 = vmax.f32 %v1289_v27, 0.0  ;;  %v1515_v31 = vpop.f32.mrb[41].mxu1  ;;  %v3314_v32 = vpop.f32.mrb[42].mxu0 }
 0x139   : > { %v1358_v33 = vmax.f32 %v1354_v2, %v1330_v25  ;;  %v1342_v34 = vadd.f32 %v1341_v24, %v1327_v5  ;;  %v1554_v35 = vmax.f32 %v1515_v31, 0.0  ;;  %v1331_v37 = vmax.f32 %v3314_v32, 0.0  ;;  %v3334_v39 = vpop.f32.mrb[42].mxu1  ;;  %v1292_v41 = vpop.f32.mrb[43].mxu0 }
 0x13a   : > { %v1584_v42 = vmax.f32 %v1580_v8, %v1556_v29  ;;  %v1356_v43 = vmax.f32 %v1352_v10, %v1328_v30  ;;  %v1568_v44 = vadd.f32 %v1567_v28, %v1553_v11  ;;  %v1557_v45 = vmax.f32 %v3334_v39, 0.0  ;;  %v1518_v46 = vpop.f32.mrb[43].mxu1 }
 0x13b   : > { %v1343_v47 = vadd.f32 %v1342_v34, %v1328_v30  ;;  %v1582_v48 = vmax.f32 %v1578_v14, %v1554_v35  ;;  %v1359_v49 = vmax.f32 %v1355_v15, %v1331_v37  ;;  %v1329_v50 = vmax.f32 %v1292_v41, 0.0 }
 0x13c   : > { %v1569_v51 = vadd.f32 %v1568_v44, %v1554_v35  ;;  %v1585_v54 = vmax.f32 %v1581_v17, %v1557_v45  ;;  %v1555_v55 = vmax.f32 %v1518_v46, 0.0 }
 0x13d   : > { %v1344_v56 = vadd.f32 %v1343_v47, %v1329_v50  ;;  %v1357_v57 = vmax.f32 %v1353_v20, %v1329_v50 }
 0x13e   : > { %v1570_v58 = vadd.f32 %v1569_v51, %v1555_v55  ;;  %v1583_v59 = vmax.f32 %v1579_v22, %v1555_v55  ;;  %v3317_v60 = vpop.f32.mrb[44].mxu0 }
 0x13f   : > { %v1345_v61 = vadd.f32 %v1344_v56, %v1330_v25  ;;  %v1334_v38 = vmax.f32 %v3317_v60, 0.0  ;;  %v3337_v62 = vpop.f32.mrb[44].mxu1  ;;  %v1305_v36 = vpop.f32.mrb[45].mxu0 }
 0x140   : > { %v1571_v63 = vadd.f32 %v1570_v58, %v1556_v29  ;;  %v1560_v40 = vmax.f32 %v3337_v62, 0.0  ;;  %v1332_v0 = vmax.f32 %v1305_v36, 0.0  ;;  %v1531_v1 = vpop.f32.mrb[45].mxu1  ;;  %v3318_v2 = vpop.f32.mrb[46].mxu0 }
 0x141   : > { %v1362_v3 = vmax.f32 %v1358_v33, %v1334_v38  ;;  %v1346_v4 = vadd.f32 %v1345_v61, %v1331_v37  ;;  %v1558_v5 = vmax.f32 %v1531_v1, 0.0  ;;  %v1335_v6 = vmax.f32 %v3318_v2, 0.0  ;;  %v3338_v7 = vpop.f32.mrb[46].mxu1  ;;  %v1308_v8 = vpop.f32.mrb[47].mxu0 }
 0x142   : > { %v1588_v9 = vmax.f32 %v1584_v42, %v1560_v40  ;;  %v1360_v10 = vmax.f32 %v1356_v43, %v1332_v0  ;;  %v1572_v11 = vadd.f32 %v1571_v63, %v1557_v45  ;;  %v1561_v12 = vmax.f32 %v3338_v7, 0.0  ;;  %v1534_v13 = vpop.f32.mrb[47].mxu1 }
 0x143   : > { %v1347_v14 = vadd.f32 %v1346_v4, %v1332_v0  ;;  %v1586_v15 = vmax.f32 %v1582_v48, %v1558_v5  ;;  %v1363_v16 = vmax.f32 %v1359_v49, %v1335_v6  ;;  %v1333_v17 = vmax.f32 %v1308_v8, 0.0 }
 0x144   : > { %v1573_v18 = vadd.f32 %v1572_v11, %v1558_v5  ;;  %v1589_v19 = vmax.f32 %v1585_v54, %v1561_v12  ;;  %v1559_v20 = vmax.f32 %v1534_v13, 0.0 }
 0x145   : > { %v1365_v21 = vmax.f32 %v1362_v3, %v1363_v16  ;;  %v1348_v22 = vadd.f32 %v1347_v14, %v1333_v17  ;;  %v1361_v23 = vmax.f32 %v1357_v57, %v1333_v17 }
 0x146   : > { %v1591_v24 = vmax.f32 %v1588_v9, %v1589_v19  ;;  %v1574_v25 = vadd.f32 %v1573_v18, %v1559_v20  ;;  %v1587_v26 = vmax.f32 %v1583_v59, %v1559_v20  ;;  %v3345_v27 = vpop.f32.mrb[48].mxu0 }
 0x147   : > { %v1349_v28 = vadd.f32 %v1348_v22, %v1334_v38  ;;  %v1364_v29 = vmax.f32 %v1360_v10, %v1361_v23  ;;  %v3365_v30 = vpop.f32.mrb[48].mxu1  ;;  %v1709_v31 = vpop.f32.mrb[49].mxu0  ;;  %v1774_v54 = vmax.f32 %v3345_v27, 0.0 }
 0x148   : > { %v1575_v32 = vadd.f32 %v1574_v25, %v1560_v40  ;;  %v1590_v33 = vmax.f32 %v1586_v15, %v1587_v26  ;;  %v1935_v34 = vpop.f32.mrb[49].mxu1  ;;  %v3346_v35 = vpop.f32.mrb[50].mxu0  ;;  %v1772_v46 = vmax.f32 %v1709_v31, 0.0  ;;  %v2000_v58 = vmax.f32 %v3365_v30, 0.0 }
 0x149   : > { %v1350_v37 = vadd.f32 %v1349_v28, %v1335_v6  ;;  %v1366_v39 = vmax.f32 %v1364_v29, %v1365_v21  ;;  %v1998_v41 = vmax.f32 %v1935_v34, 0.0  ;;  %v3366_v42 = vpop.f32.mrb[50].mxu1  ;;  %v1712_v43 = vpop.f32.mrb[51].mxu0  ;;  %v1775_v60 = vmax.f32 %v3346_v35, 0.0 }
 0x14a   : > { %v1576_v44 = vadd.f32 %v1575_v32, %v1561_v12  ;;  %v1592_v45 = vmax.f32 %v1590_v33, %v1591_v24  ;;  %v1773_v47 = vmax.f32 %v1712_v43, 0.0  ;;  %v1938_v48 = vpop.f32.mrb[51].mxu1  ;;  %v2001_v62 = vmax.f32 %v3366_v42, 0.0 }
 0x14b   : > { %v1351_v49 = vadd.f32 %v1350_v37, %v3909_v52  ;;  %v1367_v50 = vmax.f32 %v3911_v53, %v1366_v39  ;;  %v1999_v51 = vmax.f32 %v1938_v48, 0.0 }
 0x14c   : > { %v1788_v55 = vadd.f32 %v1773_v47, %v1772_v46 }
 0x14d   : > { %v3915_v56 = vadd.f32 %v1576_v44, %v1351_v49  ;;  %v3917_v57 = vmax.f32 %v1367_v50, %v1592_v45  ;;  %v2014_v59 = vadd.f32 %v1999_v51, %v1998_v41 }
 0x14e   : > { %v1789_v61 = vadd.f32 %v1788_v55, %v1774_v54  ;;  %v3349_v38 = vpop.f32.mrb[52].mxu0 }
 0x14f   : > { %v2015_v36 = vadd.f32 %v2014_v59, %v2000_v58  ;;  %v1778_v63 = vmax.f32 %v3349_v38, 0.0  ;;  %v3369_v40 = vpop.f32.mrb[52].mxu1  ;;  %v1725_v0 = vpop.f32.mrb[53].mxu0 }
 0x150   : > { %v2004_v52 = vmax.f32 %v3369_v40, 0.0  ;;  %v1776_v1 = vmax.f32 %v1725_v0, 0.0  ;;  %v1790_v53 = vadd.f32 %v1789_v61, %v1775_v60  ;;  %v1951_v2 = vpop.f32.mrb[53].mxu1  ;;  %v3350_v3 = vpop.f32.mrb[54].mxu0 }
 0x151   : > { %v1806_v4 = vmax.f32 %v1774_v54, %v1778_v63  ;;  %v2002_v5 = vmax.f32 %v1951_v2, 0.0  ;;  %v2016_v6 = vadd.f32 %v2015_v36, %v2001_v62  ;;  %v1779_v7 = vmax.f32 %v3350_v3, 0.0  ;;  %v3370_v8 = vpop.f32.mrb[54].mxu1  ;;  %v1728_v9 = vpop.f32.mrb[55].mxu0 }
 0x152   : > { %v2032_v10 = vmax.f32 %v2000_v58, %v2004_v52  ;;  %v1791_v11 = vadd.f32 %v1790_v53, %v1776_v1  ;;  %v1804_v12 = vmax.f32 %v1772_v46, %v1776_v1  ;;  %v2005_v13 = vmax.f32 %v3370_v8, 0.0  ;;  %v1954_v14 = vpop.f32.mrb[55].mxu1 }
 0x153   : > { %v2017_v15 = vadd.f32 %v2016_v6, %v2002_v5  ;;  %v2030_v16 = vmax.f32 %v1998_v41, %v2002_v5  ;;  %v1807_v17 = vmax.f32 %v1775_v60, %v1779_v7  ;;  %v1777_v18 = vmax.f32 %v1728_v9, 0.0 }
 0x154   : > { %v2033_v19 = vmax.f32 %v2001_v62, %v2005_v13  ;;  %v2003_v20 = vmax.f32 %v1954_v14, 0.0 }
 0x155   : > { %v1792_v21 = vadd.f32 %v1791_v11, %v1777_v18  ;;  %v1805_v22 = vmax.f32 %v1773_v47, %v1777_v18 }
 0x156   : > { %v2018_v23 = vadd.f32 %v2017_v15, %v2003_v20  ;;  %v2031_v24 = vmax.f32 %v1999_v51, %v2003_v20  ;;  %v3353_v25 = vpop.f32.mrb[56].mxu0 }
 0x157   : > { %v1793_v26 = vadd.f32 %v1792_v21, %v1778_v63  ;;  %v1782_v27 = vmax.f32 %v3353_v25, 0.0  ;;  %v3373_v28 = vpop.f32.mrb[56].mxu1  ;;  %v1741_v29 = vpop.f32.mrb[57].mxu0 }
 0x158   : > { %v2019_v30 = vadd.f32 %v2018_v23, %v2004_v52  ;;  %v2008_v31 = vmax.f32 %v3373_v28, 0.0  ;;  %v1780_v32 = vmax.f32 %v1741_v29, 0.0  ;;  %v1967_v33 = vpop.f32.mrb[57].mxu1  ;;  %v3354_v34 = vpop.f32.mrb[58].mxu0 }
 0x159   : > { %v1810_v35 = vmax.f32 %v1806_v4, %v1782_v27  ;;  %v1794_v37 = vadd.f32 %v1793_v26, %v1779_v7  ;;  %v2006_v39 = vmax.f32 %v1967_v33, 0.0  ;;  %v1783_v41 = vmax.f32 %v3354_v34, 0.0  ;;  %v3374_v42 = vpop.f32.mrb[58].mxu1  ;;  %v1744_v43 = vpop.f32.mrb[59].mxu0 }
 0x15a   : > { %v2036_v44 = vmax.f32 %v2032_v10, %v2008_v31  ;;  %v1808_v45 = vmax.f32 %v1804_v12, %v1780_v32  ;;  %v2020_v46 = vadd.f32 %v2019_v30, %v2005_v13  ;;  %v2009_v47 = vmax.f32 %v3374_v42, 0.0  ;;  %v1970_v48 = vpop.f32.mrb[59].mxu1 }
 0x15b   : > { %v1795_v49 = vadd.f32 %v1794_v37, %v1780_v32  ;;  %v2034_v50 = vmax.f32 %v2030_v16, %v2006_v39  ;;  %v1811_v51 = vmax.f32 %v1807_v17, %v1783_v41  ;;  %v1781_v54 = vmax.f32 %v1744_v43, 0.0 }
 0x15c   : > { %v2021_v55 = vadd.f32 %v2020_v46, %v2006_v39  ;;  %v2037_v58 = vmax.f32 %v2033_v19, %v2009_v47  ;;  %v2007_v59 = vmax.f32 %v1970_v48, 0.0 }
 0x15d   : > { %v1796_v60 = vadd.f32 %v1795_v49, %v1781_v54  ;;  %v1809_v61 = vmax.f32 %v1805_v22, %v1781_v54 }
 0x15e   : > { %v2022_v38 = vadd.f32 %v2021_v55, %v2007_v59  ;;  %v2035_v62 = vmax.f32 %v2031_v24, %v2007_v59  ;;  %v3357_v36 = vpop.f32.mrb[60].mxu0 }
 0x15f   : > { %v1797_v63 = vadd.f32 %v1796_v60, %v1782_v27  ;;  %v1786_v40 = vmax.f32 %v3357_v36, 0.0  ;;  %v3377_v0 = vpop.f32.mrb[60].mxu1  ;;  %v1757_v52 = vpop.f32.mrb[61].mxu0 }
 0x160   : > { %v2023_v1 = vadd.f32 %v2022_v38, %v2008_v31  ;;  %v2012_v53 = vmax.f32 %v3377_v0, 0.0  ;;  %v1784_v2 = vmax.f32 %v1757_v52, 0.0  ;;  %v1983_v3 = vpop.f32.mrb[61].mxu1  ;;  %v3358_v4 = vpop.f32.mrb[62].mxu0 }
 0x161   : > { %v1814_v5 = vmax.f32 %v1810_v35, %v1786_v40  ;;  %v1798_v6 = vadd.f32 %v1797_v63, %v1783_v41  ;;  %v2010_v7 = vmax.f32 %v1983_v3, 0.0  ;;  %v1787_v8 = vmax.f32 %v3358_v4, 0.0  ;;  %v3378_v9 = vpop.f32.mrb[62].mxu1  ;;  %v1760_v10 = vpop.f32.mrb[63].mxu0 }
 0x162   : > { %v2040_v11 = vmax.f32 %v2036_v44, %v2012_v53  ;;  %v1812_v12 = vmax.f32 %v1808_v45, %v1784_v2  ;;  %v2024_v13 = vadd.f32 %v2023_v1, %v2009_v47  ;;  %v2013_v14 = vmax.f32 %v3378_v9, 0.0  ;;  %v1986_v15 = vpop.f32.mrb[63].mxu1 }
 0x163   : > { %v1799_v16 = vadd.f32 %v1798_v6, %v1784_v2  ;;  %v2038_v17 = vmax.f32 %v2034_v50, %v2010_v7  ;;  %v1815_v18 = vmax.f32 %v1811_v51, %v1787_v8  ;;  %v1785_v19 = vmax.f32 %v1760_v10, 0.0 }
 0x164   : > { %v2025_v20 = vadd.f32 %v2024_v13, %v2010_v7  ;;  %v2041_v21 = vmax.f32 %v2037_v58, %v2013_v14  ;;  %v2011_v22 = vmax.f32 %v1986_v15, 0.0 }
 0x165   : > { %v1817_v23 = vmax.f32 %v1814_v5, %v1815_v18  ;;  %v1800_v24 = vadd.f32 %v1799_v16, %v1785_v19  ;;  %v1813_v25 = vmax.f32 %v1809_v61, %v1785_v19 }
 0x166   : > { %v2043_v26 = vmax.f32 %v2040_v11, %v2041_v21  ;;  %v2026_v27 = vadd.f32 %v2025_v20, %v2011_v22  ;;  %v2039_v28 = vmax.f32 %v2035_v62, %v2011_v22  ;;  %v3385_v29 = vpop.f32.mrb[64].mxu0 }
 0x167   : > { %v1801_v30 = vadd.f32 %v1800_v24, %v1786_v40  ;;  %v1816_v31 = vmax.f32 %v1812_v12, %v1813_v25  ;;  %v3405_v32 = vpop.f32.mrb[64].mxu1  ;;  %v2161_v33 = vpop.f32.mrb[65].mxu0  ;;  %v2226_v58 = vmax.f32 %v3385_v29, 0.0 }
 0x168   : > { %v2027_v34 = vadd.f32 %v2026_v27, %v2012_v53  ;;  %v2042_v35 = vmax.f32 %v2038_v17, %v2039_v28  ;;  %v2387_v37 = vpop.f32.mrb[65].mxu1  ;;  %v3386_v39 = vpop.f32.mrb[66].mxu0  ;;  %v2224_v48 = vmax.f32 %v2161_v33, 0.0  ;;  %v2452_v38 = vmax.f32 %v3405_v32, 0.0 }
 0x169   : > { %v1802_v41 = vadd.f32 %v1801_v30, %v1787_v8  ;;  %v1818_v42 = vmax.f32 %v1816_v31, %v1817_v23  ;;  %v2450_v43 = vmax.f32 %v2387_v37, 0.0  ;;  %v3406_v44 = vpop.f32.mrb[66].mxu1  ;;  %v2164_v45 = vpop.f32.mrb[67].mxu0  ;;  %v2227_v36 = vmax.f32 %v3386_v39, 0.0 }
 0x16a   : > { %v2028_v46 = vadd.f32 %v2027_v34, %v2013_v14  ;;  %v2044_v47 = vmax.f32 %v2042_v35, %v2043_v26  ;;  %v2225_v49 = vmax.f32 %v2164_v45, 0.0  ;;  %v2390_v50 = vpop.f32.mrb[67].mxu1  ;;  %v2453_v0 = vmax.f32 %v3406_v44, 0.0 }
 0x16b   : > { %v1803_v51 = vadd.f32 %v1802_v41, %v3915_v56  ;;  %v1819_v54 = vmax.f32 %v3917_v57, %v1818_v42  ;;  %v2451_v55 = vmax.f32 %v2390_v50, 0.0 }
 0x16c   : > { %v2240_v59 = vadd.f32 %v2225_v49, %v2224_v48 }
 0x16d   : > { %v3921_v60 = vadd.f32 %v2028_v46, %v1803_v51  ;;  %v3923_v61 = vmax.f32 %v1819_v54, %v2044_v47  ;;  %v2466_v62 = vadd.f32 %v2451_v55, %v2450_v43 }
 0x16e   : > { %v2241_v63 = vadd.f32 %v2240_v59, %v2226_v58  ;;  %v3389_v40 = vpop.f32.mrb[68].mxu0 }
 0x16f   : > { %v2467_v52 = vadd.f32 %v2466_v62, %v2452_v38  ;;  %v2230_v1 = vmax.f32 %v3389_v40, 0.0  ;;  %v3409_v53 = vpop.f32.mrb[68].mxu1  ;;  %v2177_v2 = vpop.f32.mrb[69].mxu0 }
 0x170   : > { %v2456_v56 = vmax.f32 %v3409_v53, 0.0  ;;  %v2228_v3 = vmax.f32 %v2177_v2, 0.0  ;;  %v2242_v57 = vadd.f32 %v2241_v63, %v2227_v36  ;;  %v2403_v4 = vpop.f32.mrb[69].mxu1  ;;  %v3390_v5 = vpop.f32.mrb[70].mxu0 }
 0x171   : > { %v2258_v6 = vmax.f32 %v2226_v58, %v2230_v1  ;;  %v2454_v7 = vmax.f32 %v2403_v4, 0.0  ;;  %v2468_v8 = vadd.f32 %v2467_v52, %v2453_v0  ;;  %v2231_v9 = vmax.f32 %v3390_v5, 0.0  ;;  %v3410_v10 = vpop.f32.mrb[70].mxu1  ;;  %v2180_v11 = vpop.f32.mrb[71].mxu0 }
 0x172   : > { %v2484_v12 = vmax.f32 %v2452_v38, %v2456_v56  ;;  %v2243_v13 = vadd.f32 %v2242_v57, %v2228_v3  ;;  %v2256_v14 = vmax.f32 %v2224_v48, %v2228_v3  ;;  %v2457_v15 = vmax.f32 %v3410_v10, 0.0  ;;  %v2406_v16 = vpop.f32.mrb[71].mxu1 }
 0x173   : > { %v2469_v17 = vadd.f32 %v2468_v8, %v2454_v7  ;;  %v2482_v18 = vmax.f32 %v2450_v43, %v2454_v7  ;;  %v2259_v19 = vmax.f32 %v2227_v36, %v2231_v9  ;;  %v2229_v20 = vmax.f32 %v2180_v11, 0.0 }
 0x174   : > { %v2485_v21 = vmax.f32 %v2453_v0, %v2457_v15  ;;  %v2455_v22 = vmax.f32 %v2406_v16, 0.0 }
 0x175   : > { %v2244_v23 = vadd.f32 %v2243_v13, %v2229_v20  ;;  %v2257_v24 = vmax.f32 %v2225_v49, %v2229_v20 }
 0x176   : > { %v2470_v25 = vadd.f32 %v2469_v17, %v2455_v22  ;;  %v2483_v26 = vmax.f32 %v2451_v55, %v2455_v22  ;;  %v3393_v27 = vpop.f32.mrb[72].mxu0 }
 0x177   : > { %v2245_v28 = vadd.f32 %v2244_v23, %v2230_v1  ;;  %v2234_v29 = vmax.f32 %v3393_v27, 0.0  ;;  %v3413_v30 = vpop.f32.mrb[72].mxu1  ;;  %v2193_v31 = vpop.f32.mrb[73].mxu0 }
 0x178   : > { %v2471_v32 = vadd.f32 %v2470_v25, %v2456_v56  ;;  %v2460_v33 = vmax.f32 %v3413_v30, 0.0  ;;  %v2232_v34 = vmax.f32 %v2193_v31, 0.0  ;;  %v2419_v35 = vpop.f32.mrb[73].mxu1  ;;  %v3394_v37 = vpop.f32.mrb[74].mxu0 }
 0x179   : > { %v2262_v39 = vmax.f32 %v2258_v6, %v2234_v29  ;;  %v2246_v41 = vadd.f32 %v2245_v28, %v2231_v9  ;;  %v2458_v42 = vmax.f32 %v2419_v35, 0.0  ;;  %v2235_v43 = vmax.f32 %v3394_v37, 0.0  ;;  %v3414_v44 = vpop.f32.mrb[74].mxu1  ;;  %v2196_v45 = vpop.f32.mrb[75].mxu0 }
 0x17a   : > { %v2488_v46 = vmax.f32 %v2484_v12, %v2460_v33  ;;  %v2260_v47 = vmax.f32 %v2256_v14, %v2232_v34  ;;  %v2472_v48 = vadd.f32 %v2471_v32, %v2457_v15  ;;  %v2461_v49 = vmax.f32 %v3414_v44, 0.0  ;;  %v2422_v50 = vpop.f32.mrb[75].mxu1 }
 0x17b   : > { %v2247_v51 = vadd.f32 %v2246_v41, %v2232_v34  ;;  %v2486_v54 = vmax.f32 %v2482_v18, %v2458_v42  ;;  %v2263_v55 = vmax.f32 %v2259_v19, %v2235_v43  ;;  %v2233_v58 = vmax.f32 %v2196_v45, 0.0 }
 0x17c   : > { %v2473_v59 = vadd.f32 %v2472_v48, %v2458_v42  ;;  %v2489_v38 = vmax.f32 %v2485_v21, %v2461_v49  ;;  %v2459_v62 = vmax.f32 %v2422_v50, 0.0 }
 0x17d   : > { %v2248_v36 = vadd.f32 %v2247_v51, %v2233_v58  ;;  %v2261_v63 = vmax.f32 %v2257_v24, %v2233_v58 }
 0x17e   : > { %v2474_v40 = vadd.f32 %v2473_v59, %v2459_v62  ;;  %v2487_v0 = vmax.f32 %v2483_v26, %v2459_v62  ;;  %v3397_v52 = vpop.f32.mrb[76].mxu0 }
 0x17f   : > { %v2249_v1 = vadd.f32 %v2248_v36, %v2234_v29  ;;  %v2238_v53 = vmax.f32 %v3397_v52, 0.0  ;;  %v3417_v2 = vpop.f32.mrb[76].mxu1  ;;  %v2209_v56 = vpop.f32.mrb[77].mxu0  ;;  %v2721_v52 = vld [vmem:[%s3941_s4] sm:$0x1] }
 0x180   : > { %v2475_v3 = vadd.f32 %v2474_v40, %v2460_v33  ;;  %v2464_v57 = vmax.f32 %v3417_v2, 0.0  ;;  %v2236_v4 = vmax.f32 %v2209_v56, 0.0  ;;  %v2435_v5 = vpop.f32.mrb[77].mxu1  ;;  %v3398_v6 = vpop.f32.mrb[78].mxu0 }
 0x181   : > { %v2266_v7 = vmax.f32 %v2262_v39, %v2238_v53  ;;  %v2250_v8 = vadd.f32 %v2249_v1, %v2235_v43  ;;  %v2462_v9 = vmax.f32 %v2435_v5, 0.0  ;;  %v2239_v10 = vmax.f32 %v3398_v6, 0.0  ;;  %v3418_v11 = vpop.f32.mrb[78].mxu1  ;;  %v2212_v12 = vpop.f32.mrb[79].mxu0 }
 0x182   : > { %v2492_v13 = vmax.f32 %v2488_v46, %v2464_v57  ;;  %v2264_v14 = vmax.f32 %v2260_v47, %v2236_v4  ;;  %v2476_v15 = vadd.f32 %v2475_v3, %v2461_v49  ;;  %v2465_v16 = vmax.f32 %v3418_v11, 0.0  ;;  %v2438_v17 = vpop.f32.mrb[79].mxu1 }
 0x183   : > { %v2251_v18 = vadd.f32 %v2250_v8, %v2236_v4  ;;  %v2490_v19 = vmax.f32 %v2486_v54, %v2462_v9  ;;  %v2267_v20 = vmax.f32 %v2263_v55, %v2239_v10  ;;  %v2237_v21 = vmax.f32 %v2212_v12, 0.0 }
 0x184   : > { %v2477_v22 = vadd.f32 %v2476_v15, %v2462_v9  ;;  %v2493_v23 = vmax.f32 %v2489_v38, %v2465_v16  ;;  %v2463_v24 = vmax.f32 %v2438_v17, 0.0 }
 0x185   : > { %v2269_v25 = vmax.f32 %v2266_v7, %v2267_v20  ;;  %v2252_v26 = vadd.f32 %v2251_v18, %v2237_v21  ;;  %v2265_v27 = vmax.f32 %v2261_v63, %v2237_v21 }
 0x186   : > { %v2495_v28 = vmax.f32 %v2492_v13, %v2493_v23  ;;  %v2478_v29 = vadd.f32 %v2477_v22, %v2463_v24  ;;  %v2491_v30 = vmax.f32 %v2487_v0, %v2463_v24 }
 0x187   : > { %v2253_v31 = vadd.f32 %v2252_v26, %v2238_v53  ;;  %v2268_v32 = vmax.f32 %v2264_v14, %v2265_v27 }
 0x188   : > { %v2479_v33 = vadd.f32 %v2478_v29, %v2464_v57  ;;  %v2494_v34 = vmax.f32 %v2490_v19, %v2491_v30 }
 0x189   : > { %v2254_v35 = vadd.f32 %v2253_v31, %v2239_v10  ;;  %v2270_v37 = vmax.f32 %v2268_v32, %v2269_v25 }
 0x18a   : > { %v2480_v39 = vadd.f32 %v2479_v33, %v2465_v16  ;;  %v2496_v41 = vmax.f32 %v2494_v34, %v2495_v28 }
 0x18b   : > { %v2255_v42 = vadd.f32 %v2254_v35, %v3921_v60  ;;  %v2271_v43 = vmax.f32 %v3923_v61, %v2270_v37 }
 0x18d   : > { %v2481_v44 = vadd.f32 %v2480_v39, %v2255_v42  ;;  %v2497_v45 = vmax.f32 %v2271_v43, %v2496_v41 }
 0x18f   : > { %v2498_v46 = vrot.slane %v2481_v44, 4  ;;  %v2506_v47 = vrot.slane %v2497_v45, 4 }
 0x191   : > { %v2499_v48 = vadd.f32 %v2498_v46, %v2481_v44  ;;  %v2507_v49 = vmax.f32 %v2497_v45, %v2506_v47 }
 0x193   : > { %v2500_v50 = vrot.slane %v2499_v48, 2  ;;  %v2508_v51 = vrot.slane %v2507_v49, 2 }
 0x195   : > { %v2501_v54 = vadd.f32 %v2500_v50, %v2499_v48  ;;  %v2509_v55 = vmax.f32 %v2507_v49, %v2508_v51 }
 0x197   : > { %v2502_v58 = vrot.slane %v2501_v54, 1  ;;  %v2510_v59 = vrot.slane %v2509_v55, 1 }
 0x199   : > { %v2511_v38 = vmax.f32 %v2509_v55, %v2510_v59  ;;  %v2503_v62 = vadd.f32 %v2502_v58, %v2501_v54 }
 0x19b   : > { %v2512_v36 = vpack.c.bf16 %v2511_v38, %v2511_v38  ;;  %v2504_v63 = vmul.f32 0.00078125, %v2503_v62 }
 0x19d   : > { %3456 = vmatmul.mubr.bf16.vlgmr.msra.gmra.mrb[80].mxu1 %v2512_v36  ;;  %v2505_v60 = vpack.c.bf16 %v2504_v63, %v2504_v63 }
 0x19f   : > { %3436 = vmatmul.mubr.bf16.vlgmr.msra.gmra.mrb[80].mxu0 %v2505_v60 }
 0x270   : > { %v2715_v61 = vpop.f32.mrb[80].mxu1 }
 0x271   : > { %v3457_v40 = vpop.f32.mrb[81].mxu1 }
 0x272   : > { %v2627_v0 = vpop.f32.mrb[80].mxu0  ;;  %v2718_v1 = vpop.f32.mrb[82].mxu1 }
 0x273   : > { %v2716_v53 = vadd.f32 %v2715_v61, %v2627_v0  ;;  %v3437_v2 = vpop.f32.mrb[81].mxu0  ;;  %v3458_v56 = vpop.f32.mrb[83].mxu1 }
 0x274   : > { %v2630_v3 = vpop.f32.mrb[82].mxu0 }
 0x275   : > { %v2722_v57 = vadd.f32 %v2721_v52, %v2716_v53  ;;  %v3438_v4 = vpop.f32.mrb[83].mxu0 }
 0x277   : > { %2723 = vst [vmem:[%s220_s16] sm:$0x1] %v2722_v57 }
 0x278 PF: > { %s15_s18 = sadd.s32 1, %s3574_s18  }
 0x279   : > { %p12_p4 = scmp.ge.s32.totalorder %s15_s18, 4  }
 0x27b   :  { %14 = sbr.rel (!%p12_p4) target bundleno = 1 (0x1), region = 79 }

</bundles_post_ra>
